<compile_context>
chip_gen: v6e
topology: v6e:2x2x1
jax: 0.10.0
libtpu: 0.0.40
codegen_flags: <defaults>
</compile_context>

<pallas_src>
import math
import jax
import jax.numpy as jnp
from jax.experimental import pallas as pl
from jax.experimental.pallas import tpu as pltpu

HIDDEN = 32          # hidden_size (small stand-in for 768)
HEADS = 4            # attention_heads (small stand-in for 12)
HEAD_DIM = HIDDEN // HEADS
NEG_INF = -1e30      # additive mask value (stand-in for float('-inf'))

VMEM_LIMIT_BYTES = 48 * 1024 * 1024   # safe on v7x (64 MiB phys) and v5e/v6e (128 MiB)


def _sum_kernel(slot_ref, turn_ref, bias_ref, mrow_ref,
                wq_ref, wk_ref, wv_ref, wo_ref,
                bq_ref, bk_ref, bv_ref, bo_ref,
                out_ref):
    """Fused multi-head attention over a block of BB turns.

    slot_ref : (BB, S, E)  bf16  query tokens
    turn_ref : (BB, T, E)  bf16  key/value tokens
    bias_ref : (BB, 1, T)  f32   additive key-padding bias (0 or NEG_INF)
    mrow_ref : (BB, 1, E)  f32   attention_mask[:, 0, :] rows
    wq_ref   : (E, E)      bf16  Wq^T * (1/sqrt(Dh))   (scale pre-folded)
    wk_ref   : (E, E)      bf16  Wk^T
    wv_ref   : (E, E)      bf16  Wv^T
    wo_ref   : (E, E)      bf16  Wo^T
    bq_ref   : (1, E)      f32   bq * (1/sqrt(Dh))
    bk_ref   : (1, E)      f32
    bv_ref   : (1, E)      f32
    bo_ref   : (1, E)      f32
    out_ref  : (BB, S, E)  f32
    """
    BB, S, E = slot_ref.shape
    T = turn_ref.shape[1]
    H = HEADS
    Dh = E // H

    # Flatten batch into the sublane dim (lane dim unchanged -> cheap reshape).
    slot = slot_ref[...].reshape(BB * S, E)          # bf16
    turn = turn_ref[...].reshape(BB * T, E)          # bf16

    # ---- fused full-width input projections (one MXU matmul each) ----
    # Scale 1/sqrt(Dh) is already folded into wq/bq on the host.
    q = jnp.dot(slot, wq_ref[...], preferred_element_type=jnp.float32) + bq_ref[...]
    # K / V as separate matmuls with immediate bf16 cast: no (BB*T, 2E) f32 temp.
    k = (jnp.dot(turn, wk_ref[...], preferred_element_type=jnp.float32)
         + bk_ref[...]).astype(jnp.bfloat16)
    v = (jnp.dot(turn, wv_ref[...], preferred_element_type=jnp.float32)
         + bv_ref[...]).astype(jnp.bfloat16)

    q3 = q.reshape(BB, S, E).astype(jnp.bfloat16)
    k3 = k.reshape(BB, T, E)
    v3 = v.reshape(BB, T, E)

    bias = jnp.broadcast_to(bias_ref[...], (BB, S, T))   # hoisted out of head loop
    mrow = mrow_ref[...]                                 # (BB, 1, E)

    # ---- per-head scores / softmax / context (static unroll; contraction = Dh) ----
    # TODO(synk): replace with batched-head einsums once Mosaic multi-batch
    # dot_general / head<->sublane relayout inside the kernel is verified.
    ctx_parts = []
    for h in range(H):
        lo = h * Dh
        qh = q3[:, :, lo:lo + Dh]                    # (BB, S, Dh)
        kh = k3[:, :, lo:lo + Dh]                    # (BB, T, Dh)
        vh = v3[:, :, lo:lo + Dh]                    # (BB, T, Dh)

        s = jnp.einsum('bsd,btd->bst', qh, kh,
                       preferred_element_type=jnp.float32) + bias        # (BB,S,T) f32
        m = jnp.max(s, axis=-1, keepdims=True)
        e = jnp.exp(s - m)
        p = e * pl.reciprocal(jnp.sum(e, axis=-1, keepdims=True), approx=True)

        ctx_parts.append(jnp.einsum('bst,btd->bsd', p.astype(jnp.bfloat16), vh,
                                    preferred_element_type=jnp.float32))  # (BB,S,Dh)
    ctx = jnp.concatenate(ctx_parts, axis=-1)            # (BB, S, E) f32

    # ---- fused output projection + output mask, direct (BB, S, E) store ----
    hidden = jnp.dot(ctx.reshape(BB * S, E).astype(jnp.bfloat16), wo_ref[...],
                     preferred_element_type=jnp.float32) + bo_ref[...]    # (BB*S, E)
    out_ref[...] = (hidden.reshape(BB, S, E) * mrow).astype(out_ref.dtype)


def _vmem_block_bytes(BB, S, T, E):
    """Rough per-step VMEM footprint (double-buffered blocks + weights + temps)."""
    bf2, f4 = 2, 4
    blocks = 2 * (BB * S * E * bf2 + BB * T * E * bf2      # slot / turn tiles
                  + BB * T * f4 + BB * E * f4              # bias / mask rows
                  + BB * S * E * f4)                        # output tile
    weights = 2 * (4 * E * E * bf2 + 4 * E * f4)            # Wq/Wk/Wv/Wo + biases
    temps = (BB * S * E * f4                                 # q (f32)
             + 2 * BB * T * E * bf2                          # k, v (bf16)
             + 2 * BB * S * T * f4                           # scores + probs (f32)
             + 2 * BB * S * E * f4)                          # ctx + hidden (f32)
    return blocks + weights + temps


def _pick_block_turns(B, S, T, E, budget_bytes):
    """Largest divisor of B whose estimated footprint fits the VMEM budget."""
    bb = 1
    for d in range(B, 0, -1):
        if B % d == 0 and _vmem_block_bytes(d, S, T, E) <= budget_bytes:
            bb = d
            break
    return bb


def slot_utterance_matching(turn_embeddings, attention_mask, slot_embeddings,
                            wq, wk, wv, wo, bq, bk, bv, bo, *, block_turns=None):
    """turn_embeddings/attention_mask: [B, T, E]; slot_embeddings: [S, B, E] (torch conv.).
    Returns hidden: [S, B, E]."""
    B, T, E = turn_embeddings.shape
    S = slot_embeddings.shape[0]

    # Turns per grid step: default to the largest block that fits the VMEM budget
    # (for small n_turns that is BB = B -> one grid step, weights loaded once).
    # On v7x, pass block_turns = B // 2 so the 2 TensorCores each get a step.
    if block_turns is None or B % block_turns != 0:
        block_turns = _pick_block_turns(B, S, T, E, int(0.75 * VMEM_LIMIT_BYTES))
    BB = block_turns
    G = B // BB

    # ---- mask preprocessing (plain JAX glue) ----
    kpm = attention_mask[:, :, 0] == 0.0                       # [B, T]  True = padding
    kpm = jnp.where(kpm[:, :1], False, kpm)                    # un-mask turns whose 1st token pads
    bias = jnp.where(kpm, NEG_INF, 0.0).astype(jnp.float32)[:, None, :]   # [B, 1, T]
    mrow = attention_mask[:, 0, :].astype(jnp.float32)[:, None, :]        # [B, 1, E]

    # ---- operand packing: bf16 MXU operands, 1/sqrt(Dh) folded into Wq/bq ----
    scale = 1.0 / math.sqrt(E // HEADS)
    slot_b = jnp.transpose(slot_embeddings, (1, 0, 2)).astype(jnp.bfloat16)   # [B, S, E]
    turn_b = turn_embeddings.astype(jnp.bfloat16)                             # [B, T, E]
    wq_t = (wq.T * scale).astype(jnp.bfloat16)                                # [E, E]
    wk_t = wk.T.astype(jnp.bfloat16)
    wv_t = wv.T.astype(jnp.bfloat16)
    wo_t = wo.T.astype(jnp.bfloat16)
    bq_r = (bq * scale).reshape(1, E).astype(jnp.float32)
    bk_r = bk.reshape(1, E).astype(jnp.float32)
    bv_r = bv.reshape(1, E).astype(jnp.float32)
    bo_r = bo.reshape(1, E).astype(jnp.float32)

    # Weight specs are grid-invariant; with BB = B (grid of 1 step per core) they
    # are fetched exactly once, so default double-buffering costs nothing extra.
    w_spec = pl.BlockSpec((E, E), lambda b: (0, 0))
    b_spec = pl.BlockSpec((1, E), lambda b: (0, 0))

    grid_spec = pltpu.PrefetchScalarGridSpec(
        num_scalar_prefetch=0,
        grid=(G,),
        in_specs=[
            pl.BlockSpec((BB, S, E), lambda b: (b, 0, 0)),     # slot (query)
            pl.BlockSpec((BB, T, E), lambda b: (b, 0, 0)),     # turn (key/value)
            pl.BlockSpec((BB, 1, T), lambda b: (b, 0, 0)),     # additive padding bias
            pl.BlockSpec((BB, 1, E), lambda b: (b, 0, 0)),     # output mask rows
            w_spec, w_spec, w_spec, w_spec,                    # Wq^T, Wk^T, Wv^T, Wo^T
            b_spec, b_spec, b_spec, b_spec,                    # bq, bk, bv, bo
        ],
        out_specs=pl.BlockSpec((BB, S, E), lambda b: (b, 0, 0)),
    )

    out = pl.pallas_call(
        _sum_kernel,
        out_shape=jax.ShapeDtypeStruct((B, S, E), jnp.float32),
        grid_spec=grid_spec,
        compiler_params=pltpu.CompilerParams(
            dimension_semantics=("parallel",),                 # megacore / v7x 2-TC sharding
            vmem_limit_bytes=VMEM_LIMIT_BYTES),
    )(slot_b, turn_b, bias, mrow,
      wq_t, wk_t, wv_t, wo_t, bq_r, bk_r, bv_r, bo_r)

    # TODO(synk): emit the (S, B, E) layout directly from the kernel (needs a
    # verified in-kernel (1,0,2) tile transpose) to remove this XLA transpose.
    return jnp.transpose(out, (1, 0, 2))                       # [S, B, E]


def reference(turn, attention_mask, slot, wq, wk, wv, wo, bq, bk, bv, bo):
    """Pure-JAX replica of the torch forward (full-matrix f32 math) for validation."""
    B, T, E = turn.shape
    S = slot.shape[0]
    H, Dh = HEADS, HEAD_DIM
    hp = jax.lax.Precision.HIGHEST

    kpm = attention_mask[:, :, 0] == 0.0
    kpm = jnp.where(kpm[:, :1], False, kpm)                    # [B, T]

    turn_t = jnp.transpose(turn, (1, 0, 2))                    # [T, B, E]
    q = jnp.einsum('sbe,fe->sbf', slot, wq, precision=hp) + bq
    k = jnp.einsum('tbe,fe->tbf', turn_t, wk, precision=hp) + bk
    v = jnp.einsum('tbe,fe->tbf', turn_t, wv, precision=hp) + bv

    qh = q.reshape(S, B, H, Dh)
    kh = k.reshape(T, B, H, Dh)
    vh = v.reshape(T, B, H, Dh)
    scores = jnp.einsum('sbhd,tbhd->bhst', qh, kh, precision=hp) / math.sqrt(Dh)
    scores = jnp.where(kpm[:, None, None, :], NEG_INF, scores)
    p = jax.nn.softmax(scores, axis=-1)
    ctx = jnp.einsum('bhst,tbhd->sbhd', p, vh, precision=hp).reshape(S, B, E)
    hidden = jnp.einsum('sbe,fe->sbf', ctx, wo, precision=hp) + bo
    hidden = hidden * attention_mask[:, 0, :][None, :, :]
    return hidden


if __name__ == "__main__":
    B, T, S, E = 4, 8, 4, HIDDEN     # n_turns=4, turn_len=8, slot_len=4, hidden=32

    key = jax.random.PRNGKey(0)
    ks = jax.random.split(key, 12)

    turn_embeddings = jax.random.normal(ks[0], (B, T, E), jnp.float32)
    slot_embeddings = jax.random.normal(ks[1], (S, B, E), jnp.float32)

    # attention mask: varied padding; turn 3 is fully padded (exercises the
    # "first token padded -> un-mask whole row" branch and the zeroed output).
    valid = jnp.array([[1, 1, 1, 1, 1, 0, 0, 0],
                       [1, 1, 1, 1, 1, 1, 1, 1],
                       [1, 1, 1, 0, 0, 0, 0, 0],
                       [0, 0, 0, 0, 0, 0, 0, 0]], jnp.float32)
    attention_mask = jnp.broadcast_to(valid[:, :, None], (B, T, E))

    std = 0.05
    wq = jax.random.normal(ks[2], (E, E), jnp.float32) * std
    wk = jax.random.normal(ks[3], (E, E), jnp.float32) * std
    wv = jax.random.normal(ks[4], (E, E), jnp.float32) * std
    wo = jax.random.normal(ks[5], (E, E), jnp.float32) * std
    bq = jax.random.normal(ks[6], (E,), jnp.float32) * 0.01
    bk = jax.random.normal(ks[7], (E,), jnp.float32) * 0.01
    bv = jax.random.normal(ks[8], (E,), jnp.float32) * 0.01
    bo = jax.random.normal(ks[9], (E,), jnp.float32) * 0.01

    out = slot_utterance_matching(turn_embeddings, attention_mask, slot_embeddings,
                                  wq, wk, wv, wo, bq, bk, bv, bo)
    out = jax.block_until_ready(out)

    ref = reference(turn_embeddings, attention_mask, slot_embeddings,
                    wq, wk, wv, wo, bq, bk, bv, bo)
    assert out.shape == (S, B, E), out.shape
    max_err = float(jnp.max(jnp.abs(out - ref)))
    # bf16 MXU operands + approx reciprocal -> slightly looser tolerance than pure f32.
    assert jnp.allclose(out, ref, atol=5e-3, rtol=5e-3), max_err

    print("KERNEL_OK")
</pallas_src>

<mosaic_0001>
module attributes {stable_mosaic.version = 11 : i64} {
  func.func @_sum_kernel(%arg0: i32, %arg1: memref<4x4x32xbf16, #tpu.memory_space<vmem>>, %arg2: memref<4x8x32xbf16, #tpu.memory_space<vmem>>, %arg3: memref<4x1x8xf32, #tpu.memory_space<vmem>>, %arg4: memref<4x1x32xf32, #tpu.memory_space<vmem>>, %arg5: memref<32x32xbf16, #tpu.memory_space<vmem>>, %arg6: memref<32x32xbf16, #tpu.memory_space<vmem>>, %arg7: memref<32x32xbf16, #tpu.memory_space<vmem>>, %arg8: memref<32x32xbf16, #tpu.memory_space<vmem>>, %arg9: memref<1x32xf32, #tpu.memory_space<vmem>>, %arg10: memref<1x32xf32, #tpu.memory_space<vmem>>, %arg11: memref<1x32xf32, #tpu.memory_space<vmem>>, %arg12: memref<1x32xf32, #tpu.memory_space<vmem>>, %arg13: memref<4x4x32xf32, #tpu.memory_space<vmem>>) attributes {dimension_semantics = [#tpu.dimension_semantics<parallel>], iteration_bounds = array<i64: 1>, scalar_prefetch = 0 : i64, scratch_operands = 0 : i64, tpu.core_type = #tpu.core_type<tc>, window_params = [{transform_indices = @transform_0, window_bounds = array<i64: 4, 4, 32>}, {transform_indices = @transform_1, window_bounds = array<i64: 4, 8, 32>}, {transform_indices = @transform_2, window_bounds = array<i64: 4, 1, 8>}, {transform_indices = @transform_3, window_bounds = array<i64: 4, 1, 32>}, {pipeline_mode = #tpu.pipeline_mode<synchronous>, transform_indices = @transform_4, window_bounds = array<i64: 32, 32>}, {pipeline_mode = #tpu.pipeline_mode<synchronous>, transform_indices = @transform_5, window_bounds = array<i64: 32, 32>}, {pipeline_mode = #tpu.pipeline_mode<synchronous>, transform_indices = @transform_6, window_bounds = array<i64: 32, 32>}, {pipeline_mode = #tpu.pipeline_mode<synchronous>, transform_indices = @transform_7, window_bounds = array<i64: 32, 32>}, {pipeline_mode = #tpu.pipeline_mode<synchronous>, transform_indices = @transform_8, window_bounds = array<i64: 1, 32>}, {pipeline_mode = #tpu.pipeline_mode<synchronous>, transform_indices = @transform_9, window_bounds = array<i64: 1, 32>}, {pipeline_mode = #tpu.pipeline_mode<synchronous>, transform_indices = @transform_10, window_bounds = array<i64: 1, 32>}, {pipeline_mode = #tpu.pipeline_mode<synchronous>, transform_indices = @transform_11, window_bounds = array<i64: 1, 32>}, {transform_indices = @transform_12, window_bounds = array<i64: 4, 4, 32>}]} {
    %c0 = arith.constant 0 : index
    %c0_0 = arith.constant 0 : index
    %c0_1 = arith.constant 0 : index
    %0 = vector.load %arg1[%c0, %c0_0, %c0_1] : memref<4x4x32xbf16, #tpu.memory_space<vmem>>, vector<4x4x32xbf16>
    %1 = vector.shape_cast %0 : vector<4x4x32xbf16> to vector<16x32xbf16>
    %c0_2 = arith.constant 0 : index
    %c0_3 = arith.constant 0 : index
    %c0_4 = arith.constant 0 : index
    %2 = vector.load %arg2[%c0_2, %c0_3, %c0_4] : memref<4x8x32xbf16, #tpu.memory_space<vmem>>, vector<4x8x32xbf16>
    %3 = vector.shape_cast %2 : vector<4x8x32xbf16> to vector<32x32xbf16>
    %c0_5 = arith.constant 0 : index
    %c0_6 = arith.constant 0 : index
    %4 = vector.load %arg5[%c0_5, %c0_6] : memref<32x32xbf16, #tpu.memory_space<vmem>>, vector<32x32xbf16>
    %cst = arith.constant dense<0.000000e+00> : vector<16x32xf32>
    %5 = tpu.matmul %1, %4, %cst {dimension_numbers = #tpu.dot_dimension_numbers<[1], [0], [0], [1], [0, 0, 1, 1], [], []>} : vector<16x32xbf16>, vector<32x32xbf16>, vector<16x32xf32> -> vector<16x32xf32>
    %c0_7 = arith.constant 0 : index
    %c0_8 = arith.constant 0 : index
    %6 = vector.load %arg9[%c0_7, %c0_8] : memref<1x32xf32, #tpu.memory_space<vmem>>, vector<1x32xf32>
    %7 = vector.broadcast %6 : vector<1x32xf32> to vector<16x32xf32>
    %8 = arith.addf %5, %7 : vector<16x32xf32>
    %c0_9 = arith.constant 0 : index
    %c0_10 = arith.constant 0 : index
    %9 = vector.load %arg6[%c0_9, %c0_10] : memref<32x32xbf16, #tpu.memory_space<vmem>>, vector<32x32xbf16>
    %cst_11 = arith.constant dense<0.000000e+00> : vector<32x32xf32>
    %10 = tpu.matmul %3, %9, %cst_11 {dimension_numbers = #tpu.dot_dimension_numbers<[1], [0], [0], [1], [0, 0, 1, 1], [], []>} : vector<32x32xbf16>, vector<32x32xbf16>, vector<32x32xf32> -> vector<32x32xf32>
    %c0_12 = arith.constant 0 : index
    %c0_13 = arith.constant 0 : index
    %11 = vector.load %arg10[%c0_12, %c0_13] : memref<1x32xf32, #tpu.memory_space<vmem>>, vector<1x32xf32>
    %12 = vector.broadcast %11 : vector<1x32xf32> to vector<32x32xf32>
    %13 = arith.addf %10, %12 : vector<32x32xf32>
    %14 = arith.truncf %13 : vector<32x32xf32> to vector<32x32xbf16>
    %c0_14 = arith.constant 0 : index
    %c0_15 = arith.constant 0 : index
    %15 = vector.load %arg7[%c0_14, %c0_15] : memref<32x32xbf16, #tpu.memory_space<vmem>>, vector<32x32xbf16>
    %cst_16 = arith.constant dense<0.000000e+00> : vector<32x32xf32>
    %16 = tpu.matmul %3, %15, %cst_16 {dimension_numbers = #tpu.dot_dimension_numbers<[1], [0], [0], [1], [0, 0, 1, 1], [], []>} : vector<32x32xbf16>, vector<32x32xbf16>, vector<32x32xf32> -> vector<32x32xf32>
    %c0_17 = arith.constant 0 : index
    %c0_18 = arith.constant 0 : index
    %17 = vector.load %arg11[%c0_17, %c0_18] : memref<1x32xf32, #tpu.memory_space<vmem>>, vector<1x32xf32>
    %18 = vector.broadcast %17 : vector<1x32xf32> to vector<32x32xf32>
    %19 = arith.addf %16, %18 : vector<32x32xf32>
    %20 = arith.truncf %19 : vector<32x32xf32> to vector<32x32xbf16>
    %21 = vector.shape_cast %8 : vector<16x32xf32> to vector<4x4x32xf32>
    %22 = arith.truncf %21 : vector<4x4x32xf32> to vector<4x4x32xbf16>
    %23 = vector.shape_cast %14 : vector<32x32xbf16> to vector<4x8x32xbf16>
    %24 = vector.shape_cast %20 : vector<32x32xbf16> to vector<4x8x32xbf16>
    %c0_19 = arith.constant 0 : index
    %c0_20 = arith.constant 0 : index
    %c0_21 = arith.constant 0 : index
    %25 = vector.load %arg3[%c0_19, %c0_20, %c0_21] : memref<4x1x8xf32, #tpu.memory_space<vmem>>, vector<4x1x8xf32>
    %26 = vector.shape_cast %25 : vector<4x1x8xf32> to vector<4x1x8xf32>
    %27 = vector.broadcast %26 : vector<4x1x8xf32> to vector<4x4x8xf32>
    %c0_22 = arith.constant 0 : index
    %c0_23 = arith.constant 0 : index
    %c0_24 = arith.constant 0 : index
    %28 = vector.load %arg4[%c0_22, %c0_23, %c0_24] : memref<4x1x32xf32, #tpu.memory_space<vmem>>, vector<4x1x32xf32>
    %29 = vector.extract_strided_slice %22 {offsets = [0, 0, 0], sizes = [4, 4, 8], strides = [1, 1, 1]} : vector<4x4x32xbf16> to vector<4x4x8xbf16>
    %30 = vector.extract_strided_slice %23 {offsets = [0, 0, 0], sizes = [4, 8, 8], strides = [1, 1, 1]} : vector<4x8x32xbf16> to vector<4x8x8xbf16>
    %31 = vector.extract_strided_slice %24 {offsets = [0, 0, 0], sizes = [4, 8, 8], strides = [1, 1, 1]} : vector<4x8x32xbf16> to vector<4x8x8xbf16>
    "tpu.trace_start"() <{level = 10 : i32, message = "bsd,btd->bst"}> : () -> ()
    %cst_25 = arith.constant dense<0.000000e+00> : vector<4x4x8xf32>
    %32 = tpu.matmul %29, %30, %cst_25 {dimension_numbers = #tpu.dot_dimension_numbers<[2], [2], [1], [1], [0, 0, 0, 1, 1, 1], [0], [0]>} : vector<4x4x8xbf16>, vector<4x8x8xbf16>, vector<4x4x8xf32> -> vector<4x4x8xf32>
    "tpu.trace_stop"() : () -> ()
    %33 = arith.addf %32, %27 : vector<4x4x8xf32>
    %cst_26 = arith.constant dense<0xFF800000> : vector<4x4xf32>
    %34 = vector.multi_reduction <maximumf>, %33, %cst_26 [2] : vector<4x4x8xf32> to vector<4x4xf32>
    %35 = vector.shape_cast %34 : vector<4x4xf32> to vector<4x4x1xf32>
    %36 = vector.broadcast %35 : vector<4x4x1xf32> to vector<4x4x8xf32>
    %37 = arith.subf %33, %36 : vector<4x4x8xf32>
    %38 = math.exp %37 : vector<4x4x8xf32>
    %cst_27 = arith.constant dense<0.000000e+00> : vector<4x4xf32>
    %39 = vector.multi_reduction <add>, %38, %cst_27 [2] : vector<4x4x8xf32> to vector<4x4xf32>
    %40 = vector.shape_cast %39 : vector<4x4xf32> to vector<4x4x1xf32>
    %41 = tpu.reciprocal %40 {approx = true} : vector<4x4x1xf32> -> vector<4x4x1xf32>
    %42 = vector.broadcast %41 : vector<4x4x1xf32> to vector<4x4x8xf32>
    %43 = arith.mulf %38, %42 : vector<4x4x8xf32>
    %44 = arith.truncf %43 : vector<4x4x8xf32> to vector<4x4x8xbf16>
    "tpu.trace_start"() <{level = 10 : i32, message = "bst,btd->bsd"}> : () -> ()
    %cst_28 = arith.constant dense<0.000000e+00> : vector<4x4x8xf32>
    %45 = tpu.matmul %44, %31, %cst_28 {dimension_numbers = #tpu.dot_dimension_numbers<[2], [1], [1], [2], [0, 0, 0, 1, 1, 2], [0], [0]>} : vector<4x4x8xbf16>, vector<4x8x8xbf16>, vector<4x4x8xf32> -> vector<4x4x8xf32>
    "tpu.trace_stop"() : () -> ()
    %46 = vector.extract_strided_slice %22 {offsets = [0, 0, 8], sizes = [4, 4, 8], strides = [1, 1, 1]} : vector<4x4x32xbf16> to vector<4x4x8xbf16>
    %47 = vector.extract_strided_slice %23 {offsets = [0, 0, 8], sizes = [4, 8, 8], strides = [1, 1, 1]} : vector<4x8x32xbf16> to vector<4x8x8xbf16>
    %48 = vector.extract_strided_slice %24 {offsets = [0, 0, 8], sizes = [4, 8, 8], strides = [1, 1, 1]} : vector<4x8x32xbf16> to vector<4x8x8xbf16>
    "tpu.trace_start"() <{level = 10 : i32, message = "bsd,btd->bst"}> : () -> ()
    %cst_29 = arith.constant dense<0.000000e+00> : vector<4x4x8xf32>
    %49 = tpu.matmul %46, %47, %cst_29 {dimension_numbers = #tpu.dot_dimension_numbers<[2], [2], [1], [1], [0, 0, 0, 1, 1, 1], [0], [0]>} : vector<4x4x8xbf16>, vector<4x8x8xbf16>, vector<4x4x8xf32> -> vector<4x4x8xf32>
    "tpu.trace_stop"() : () -> ()
    %50 = arith.addf %49, %27 : vector<4x4x8xf32>
    %cst_30 = arith.constant dense<0xFF800000> : vector<4x4xf32>
    %51 = vector.multi_reduction <maximumf>, %50, %cst_30 [2] : vector<4x4x8xf32> to vector<4x4xf32>
    %52 = vector.shape_cast %51 : vector<4x4xf32> to vector<4x4x1xf32>
    %53 = vector.broadcast %52 : vector<4x4x1xf32> to vector<4x4x8xf32>
    %54 = arith.subf %50, %53 : vector<4x4x8xf32>
    %55 = math.exp %54 : vector<4x4x8xf32>
    %cst_31 = arith.constant dense<0.000000e+00> : vector<4x4xf32>
    %56 = vector.multi_reduction <add>, %55, %cst_31 [2] : vector<4x4x8xf32> to vector<4x4xf32>
    %57 = vector.shape_cast %56 : vector<4x4xf32> to vector<4x4x1xf32>
    %58 = tpu.reciprocal %57 {approx = true} : vector<4x4x1xf32> -> vector<4x4x1xf32>
    %59 = vector.broadcast %58 : vector<4x4x1xf32> to vector<4x4x8xf32>
    %60 = arith.mulf %55, %59 : vector<4x4x8xf32>
    %61 = arith.truncf %60 : vector<4x4x8xf32> to vector<4x4x8xbf16>
    "tpu.trace_start"() <{level = 10 : i32, message = "bst,btd->bsd"}> : () -> ()
    %cst_32 = arith.constant dense<0.000000e+00> : vector<4x4x8xf32>
    %62 = tpu.matmul %61, %48, %cst_32 {dimension_numbers = #tpu.dot_dimension_numbers<[2], [1], [1], [2], [0, 0, 0, 1, 1, 2], [0], [0]>} : vector<4x4x8xbf16>, vector<4x8x8xbf16>, vector<4x4x8xf32> -> vector<4x4x8xf32>
    "tpu.trace_stop"() : () -> ()
    %63 = vector.extract_strided_slice %22 {offsets = [0, 0, 16], sizes = [4, 4, 8], strides = [1, 1, 1]} : vector<4x4x32xbf16> to vector<4x4x8xbf16>
    %64 = vector.extract_strided_slice %23 {offsets = [0, 0, 16], sizes = [4, 8, 8], strides = [1, 1, 1]} : vector<4x8x32xbf16> to vector<4x8x8xbf16>
    %65 = vector.extract_strided_slice %24 {offsets = [0, 0, 16], sizes = [4, 8, 8], strides = [1, 1, 1]} : vector<4x8x32xbf16> to vector<4x8x8xbf16>
    "tpu.trace_start"() <{level = 10 : i32, message = "bsd,btd->bst"}> : () -> ()
    %cst_33 = arith.constant dense<0.000000e+00> : vector<4x4x8xf32>
    %66 = tpu.matmul %63, %64, %cst_33 {dimension_numbers = #tpu.dot_dimension_numbers<[2], [2], [1], [1], [0, 0, 0, 1, 1, 1], [0], [0]>} : vector<4x4x8xbf16>, vector<4x8x8xbf16>, vector<4x4x8xf32> -> vector<4x4x8xf32>
    "tpu.trace_stop"() : () -> ()
    %67 = arith.addf %66, %27 : vector<4x4x8xf32>
    %cst_34 = arith.constant dense<0xFF800000> : vector<4x4xf32>
    %68 = vector.multi_reduction <maximumf>, %67, %cst_34 [2] : vector<4x4x8xf32> to vector<4x4xf32>
    %69 = vector.shape_cast %68 : vector<4x4xf32> to vector<4x4x1xf32>
    %70 = vector.broadcast %69 : vector<4x4x1xf32> to vector<4x4x8xf32>
    %71 = arith.subf %67, %70 : vector<4x4x8xf32>
    %72 = math.exp %71 : vector<4x4x8xf32>
    %cst_35 = arith.constant dense<0.000000e+00> : vector<4x4xf32>
    %73 = vector.multi_reduction <add>, %72, %cst_35 [2] : vector<4x4x8xf32> to vector<4x4xf32>
    %74 = vector.shape_cast %73 : vector<4x4xf32> to vector<4x4x1xf32>
    %75 = tpu.reciprocal %74 {approx = true} : vector<4x4x1xf32> -> vector<4x4x1xf32>
    %76 = vector.broadcast %75 : vector<4x4x1xf32> to vector<4x4x8xf32>
    %77 = arith.mulf %72, %76 : vector<4x4x8xf32>
    %78 = arith.truncf %77 : vector<4x4x8xf32> to vector<4x4x8xbf16>
    "tpu.trace_start"() <{level = 10 : i32, message = "bst,btd->bsd"}> : () -> ()
    %cst_36 = arith.constant dense<0.000000e+00> : vector<4x4x8xf32>
    %79 = tpu.matmul %78, %65, %cst_36 {dimension_numbers = #tpu.dot_dimension_numbers<[2], [1], [1], [2], [0, 0, 0, 1, 1, 2], [0], [0]>} : vector<4x4x8xbf16>, vector<4x8x8xbf16>, vector<4x4x8xf32> -> vector<4x4x8xf32>
    "tpu.trace_stop"() : () -> ()
    %80 = vector.extract_strided_slice %22 {offsets = [0, 0, 24], sizes = [4, 4, 8], strides = [1, 1, 1]} : vector<4x4x32xbf16> to vector<4x4x8xbf16>
    %81 = vector.extract_strided_slice %23 {offsets = [0, 0, 24], sizes = [4, 8, 8], strides = [1, 1, 1]} : vector<4x8x32xbf16> to vector<4x8x8xbf16>
    %82 = vector.extract_strided_slice %24 {offsets = [0, 0, 24], sizes = [4, 8, 8], strides = [1, 1, 1]} : vector<4x8x32xbf16> to vector<4x8x8xbf16>
    "tpu.trace_start"() <{level = 10 : i32, message = "bsd,btd->bst"}> : () -> ()
    %cst_37 = arith.constant dense<0.000000e+00> : vector<4x4x8xf32>
    %83 = tpu.matmul %80, %81, %cst_37 {dimension_numbers = #tpu.dot_dimension_numbers<[2], [2], [1], [1], [0, 0, 0, 1, 1, 1], [0], [0]>} : vector<4x4x8xbf16>, vector<4x8x8xbf16>, vector<4x4x8xf32> -> vector<4x4x8xf32>
    "tpu.trace_stop"() : () -> ()
    %84 = arith.addf %83, %27 : vector<4x4x8xf32>
    %cst_38 = arith.constant dense<0xFF800000> : vector<4x4xf32>
    %85 = vector.multi_reduction <maximumf>, %84, %cst_38 [2] : vector<4x4x8xf32> to vector<4x4xf32>
    %86 = vector.shape_cast %85 : vector<4x4xf32> to vector<4x4x1xf32>
    %87 = vector.broadcast %86 : vector<4x4x1xf32> to vector<4x4x8xf32>
    %88 = arith.subf %84, %87 : vector<4x4x8xf32>
    %89 = math.exp %88 : vector<4x4x8xf32>
    %cst_39 = arith.constant dense<0.000000e+00> : vector<4x4xf32>
    %90 = vector.multi_reduction <add>, %89, %cst_39 [2] : vector<4x4x8xf32> to vector<4x4xf32>
    %91 = vector.shape_cast %90 : vector<4x4xf32> to vector<4x4x1xf32>
    %92 = tpu.reciprocal %91 {approx = true} : vector<4x4x1xf32> -> vector<4x4x1xf32>
    %93 = vector.broadcast %92 : vector<4x4x1xf32> to vector<4x4x8xf32>
    %94 = arith.mulf %89, %93 : vector<4x4x8xf32>
    %95 = arith.truncf %94 : vector<4x4x8xf32> to vector<4x4x8xbf16>
    "tpu.trace_start"() <{level = 10 : i32, message = "bst,btd->bsd"}> : () -> ()
    %cst_40 = arith.constant dense<0.000000e+00> : vector<4x4x8xf32>
    %96 = tpu.matmul %95, %82, %cst_40 {dimension_numbers = #tpu.dot_dimension_numbers<[2], [1], [1], [2], [0, 0, 0, 1, 1, 2], [0], [0]>} : vector<4x4x8xbf16>, vector<4x8x8xbf16>, vector<4x4x8xf32> -> vector<4x4x8xf32>
    "tpu.trace_stop"() : () -> ()
    %97 = tpu.concatenate %45, %62, %79, %96 in 2 : vector<4x4x8xf32>, vector<4x4x8xf32>, vector<4x4x8xf32>, vector<4x4x8xf32> -> vector<4x4x32xf32>
    %98 = vector.shape_cast %97 : vector<4x4x32xf32> to vector<16x32xf32>
    %99 = arith.truncf %98 : vector<16x32xf32> to vector<16x32xbf16>
    %c0_41 = arith.constant 0 : index
    %c0_42 = arith.constant 0 : index
    %100 = vector.load %arg8[%c0_41, %c0_42] : memref<32x32xbf16, #tpu.memory_space<vmem>>, vector<32x32xbf16>
    %cst_43 = arith.constant dense<0.000000e+00> : vector<16x32xf32>
    %101 = tpu.matmul %99, %100, %cst_43 {dimension_numbers = #tpu.dot_dimension_numbers<[1], [0], [0], [1], [0, 0, 1, 1], [], []>} : vector<16x32xbf16>, vector<32x32xbf16>, vector<16x32xf32> -> vector<16x32xf32>
    %c0_44 = arith.constant 0 : index
    %c0_45 = arith.constant 0 : index
    %102 = vector.load %arg12[%c0_44, %c0_45] : memref<1x32xf32, #tpu.memory_space<vmem>>, vector<1x32xf32>
    %103 = vector.broadcast %102 : vector<1x32xf32> to vector<16x32xf32>
    %104 = arith.addf %101, %103 : vector<16x32xf32>
    %105 = vector.shape_cast %104 : vector<16x32xf32> to vector<4x4x32xf32>
    %106 = vector.broadcast %28 : vector<4x1x32xf32> to vector<4x4x32xf32>
    %107 = arith.mulf %105, %106 : vector<4x4x32xf32>
    %c0_46 = arith.constant 0 : index
    %c0_47 = arith.constant 0 : index
    %c0_48 = arith.constant 0 : index
    %108 = vector.load %arg13[%c0_46, %c0_47, %c0_48] : memref<4x4x32xf32, #tpu.memory_space<vmem>>, vector<4x4x32xf32>
    tpu.vector_store %arg13[%c0_46, %c0_47, %c0_48], %107 {strides = array<i32>} : memref<4x4x32xf32, #tpu.memory_space<vmem>>, vector<4x4x32xf32>,
    return
  }
  func.func @transform_0(%arg0: i32) -> (i32, i32, i32) {
    %c0_i32 = arith.constant 0 : i32
    %c0_i32_0 = arith.constant 0 : i32
    %c0_i32_1 = arith.constant 0 : i32
    return %arg0, %c0_i32, %c0_i32_0 : i32, i32, i32
  }
  func.func @transform_1(%arg0: i32) -> (i32, i32, i32) {
    %c0_i32 = arith.constant 0 : i32
    %c0_i32_0 = arith.constant 0 : i32
    %c0_i32_1 = arith.constant 0 : i32
    return %arg0, %c0_i32, %c0_i32_0 : i32, i32, i32
  }
  func.func @transform_2(%arg0: i32) -> (i32, i32, i32) {
    %c0_i32 = arith.constant 0 : i32
    %c0_i32_0 = arith.constant 0 : i32
    %c0_i32_1 = arith.constant 0 : i32
    return %arg0, %c0_i32, %c0_i32_0 : i32, i32, i32
  }
  func.func @transform_3(%arg0: i32) -> (i32, i32, i32) {
    %c0_i32 = arith.constant 0 : i32
    %c0_i32_0 = arith.constant 0 : i32
    %c0_i32_1 = arith.constant 0 : i32
    return %arg0, %c0_i32, %c0_i32_0 : i32, i32, i32
  }
  func.func @transform_4(%arg0: i32) -> (i32, i32) {
    %c0_i32 = arith.constant 0 : i32
    %c0_i32_0 = arith.constant 0 : i32
    %c0_i32_1 = arith.constant 0 : i32
    return %c0_i32, %c0_i32_0 : i32, i32
  }
  func.func @transform_5(%arg0: i32) -> (i32, i32) {
    %c0_i32 = arith.constant 0 : i32
    %c0_i32_0 = arith.constant 0 : i32
    %c0_i32_1 = arith.constant 0 : i32
    return %c0_i32, %c0_i32_0 : i32, i32
  }
  func.func @transform_6(%arg0: i32) -> (i32, i32) {
    %c0_i32 = arith.constant 0 : i32
    %c0_i32_0 = arith.constant 0 : i32
    %c0_i32_1 = arith.constant 0 : i32
    return %c0_i32, %c0_i32_0 : i32, i32
  }
  func.func @transform_7(%arg0: i32) -> (i32, i32) {
    %c0_i32 = arith.constant 0 : i32
    %c0_i32_0 = arith.constant 0 : i32
    %c0_i32_1 = arith.constant 0 : i32
    return %c0_i32, %c0_i32_0 : i32, i32
  }
  func.func @transform_8(%arg0: i32) -> (i32, i32) {
    %c0_i32 = arith.constant 0 : i32
    %c0_i32_0 = arith.constant 0 : i32
    %c0_i32_1 = arith.constant 0 : i32
    return %c0_i32, %c0_i32_0 : i32, i32
  }
  func.func @transform_9(%arg0: i32) -> (i32, i32) {
    %c0_i32 = arith.constant 0 : i32
    %c0_i32_0 = arith.constant 0 : i32
    %c0_i32_1 = arith.constant 0 : i32
    return %c0_i32, %c0_i32_0 : i32, i32
  }
  func.func @transform_10(%arg0: i32) -> (i32, i32) {
    %c0_i32 = arith.constant 0 : i32
    %c0_i32_0 = arith.constant 0 : i32
    %c0_i32_1 = arith.constant 0 : i32
    return %c0_i32, %c0_i32_0 : i32, i32
  }
  func.func @transform_11(%arg0: i32) -> (i32, i32) {
    %c0_i32 = arith.constant 0 : i32
    %c0_i32_0 = arith.constant 0 : i32
    %c0_i32_1 = arith.constant 0 : i32
    return %c0_i32, %c0_i32_0 : i32, i32
  }
  func.func @transform_12(%arg0: i32) -> (i32, i32, i32) {
    %c0_i32 = arith.constant 0 : i32
    %c0_i32_0 = arith.constant 0 : i32
    %c0_i32_1 = arith.constant 0 : i32
    return %arg0, %c0_i32, %c0_i32_0 : i32, i32, i32
  }
}

</mosaic_0001>

<bundles_post_ra>
// kernel: tpu_custom_call.1
= control target key start
LH: loop header
LB: loop body
LE: loop exit
PB: predicated region body
PF: predicated region fallthrough
CT: control target
= control target key end

     0   :  { %17 = vsyncpa [#allocation3], 0  ;;  %s3588_s0 = inlined_call_operand.hbm [shape: bf16[4,4,32], index: 0, kind: input, shape index: {}]   ;;  %s3589_s1 = inlined_call_operand.hbm [shape: bf16[4,8,32], index: 1, kind: input, shape index: {}]   ;;  %s3590_s2 = inlined_call_operand.hbm [shape: f32[4,1,8], index: 2, kind: input, shape index: {}]   ;;  %s3591_s3 = inlined_call_operand.vmem [shape: f32[4,1,32], index: 3, kind: input, shape index: {}]   ;;  %s3592_s4 = inlined_call_operand.hbm [shape: bf16[32,32], index: 4, kind: input, shape index: {}]   ;;  %s3593_s5 = inlined_call_operand.hbm [shape: bf16[32,32], index: 5, kind: input, shape index: {}]   ;;  %s3594_s6 = inlined_call_operand.hbm [shape: bf16[32,32], index: 6, kind: input, shape index: {}]   ;;  %s3595_s7 = inlined_call_operand.hbm [shape: bf16[32,32], index: 7, kind: input, shape index: {}]   ;;  %s3596_s8 = inlined_call_operand.vmem [shape: f32[1,32], index: 8, kind: input, shape index: {}]   ;;  %s3597_s9 = inlined_call_operand.vmem [shape: f32[1,32], index: 9, kind: input, shape index: {}]   ;;  %s3598_s10 = inlined_call_operand.vmem [shape: f32[1,32], index: 10, kind: input, shape index: {}]   ;;  %s3599_s11 = inlined_call_operand.vmem [shape: f32[1,32], index: 11, kind: input, shape index: {}]   ;;  %s3600_s12 = inlined_call_operand.hbm [shape: f32[4,4,32], index: 12, kind: output, shape index: {}]  }
   0x1   :  { %18 = vsyncpa [#allocation6], 0 }
   0x2   :  { %19 = vsyncpa [#allocation9], 0 }
   0x3   :  { %20 = vsyncpa [#allocation12], 0 }
   0x4   :  { %21 = vsyncpa [#allocation4], 0  ;;  %s3045_s21 = smov [#allocation5]  }
   0x5   :  { %s39_s22 = sshll.u32 %s3045_s21, 4  ;;  %s40_s22 = int_to_ptr.vmem [resolvable:$true] %s39_s22 }
   0x6   :  { %s2883_s23 = scalar_lea.vmem %s40_s22, 256  ;;  %p2888_p1 = scmp.lt.s32.totalorder %s40_s22, %s40_s22 }
   0x7   :  { %p2884_p0 = scmp.ne.s32.totalorder %s40_s22, %s2883_s23  ;;  %p2889_p2 = scmp.lt.s32.totalorder %s2883_s23, %s2883_s23 }
   0x9   :  { %p2890_p3 = por %p2889_p2, %p2888_p1 }
   0xb   :  { %p2891_p4 = pnand %p2890_p3, %p2884_p0 }
   0xd   :  { %2894 = shalt.err (!%p2891_p4)
}
   0xe   :  { %s3046_s24 = smov 64   ;;  %s3047_s25 = smov 4  }
   0xf   :  { %45 = dma.hbm_to_vmem [thread:$0]  %s3589_s1, 256, %s40_s22, [#allocation6], %s3046_s24, %s3046_s24, %s3047_s25  }
  0x10   :  { %s3048_s28 = smov [#allocation8]   ;;  %s3049_s30 = smov [#allocation11]  }
  0x11   :  { %s65_s29 = sshll.u32 %s3048_s28, 4  ;;  %s89_s13 = sshll.u32 %s3049_s30, 4  ;;  %s66_s29 = int_to_ptr.vmem [resolvable:$true] %s65_s29  ;;  %s90_s13 = int_to_ptr.vmem [resolvable:$true] %s89_s13 }
  0x12   :  { %s2903_s14 = scalar_lea.vmem %s66_s29, 256  ;;  %p2908_p6 = scmp.lt.s32.totalorder %s66_s29, %s66_s29 }
  0x13   :  { %p2904_p5 = scmp.ne.s32.totalorder %s66_s29, %s2903_s14  ;;  %p2909_p7 = scmp.lt.s32.totalorder %s2903_s14, %s2903_s14 }
  0x15   :  { %p2910_p8 = por %p2909_p7, %p2908_p6 }
  0x17   :  { %p2911_p9 = pnand %p2910_p8, %p2904_p5 }
  0x19   :  { %2914 = shalt.err (!%p2911_p9)
}
  0x1a   :  { %71 = dma.hbm_to_vmem [thread:$0]  %s3592_s4, 256, %s66_s29, [#allocation9], %s3046_s24, %s3046_s24, %s3047_s25  }
  0x1b   :  { %s2923_s1 = scalar_lea.vmem %s90_s13, 256  ;;  %p2928_p11 = scmp.lt.s32.totalorder %s90_s13, %s90_s13 }
  0x1c   :  { %p2924_p10 = scmp.ne.s32.totalorder %s90_s13, %s2923_s1  ;;  %p2929_p12 = scmp.lt.s32.totalorder %s2923_s1, %s2923_s1 }
  0x1e   :  { %p2930_p13 = por %p2929_p12, %p2928_p11 }
  0x20   :  { %p2931_p0 = pnand %p2930_p13, %p2924_p10 }
  0x22   :  { %2934 = shalt.err (!%p2931_p0)
}
  0x23   :  { %95 = dma.hbm_to_vmem [thread:$0]  %s3594_s6, 256, %s90_s13, [#allocation12], %s3046_s24, %s3046_s24, %s3047_s25  }
  0x24   :  { %s3050_s19 = smov [#allocation2]  }
  0x25   :  { %s27_s20 = sshll.u32 %s3050_s19, 4  ;;  %s28_s20 = int_to_ptr.vmem [resolvable:$true] %s27_s20 }
  0x26   :  { %s2943_s21 = scalar_lea.vmem %s28_s20, 128  ;;  %p2948_p2 = scmp.lt.s32.totalorder %s28_s20, %s28_s20 }
  0x27   :  { %p2944_p1 = scmp.ne.s32.totalorder %s28_s20, %s2943_s21  ;;  %p2949_p3 = scmp.lt.s32.totalorder %s2943_s21, %s2943_s21 }
  0x29   :  { %p2950_p4 = por %p2949_p3, %p2948_p2 }
  0x2b   :  { %p2951_p5 = pnand %p2950_p4, %p2944_p1 }
  0x2d   :  { %2954 = shalt.err (!%p2951_p5)
}
  0x2e   :  { %s3051_s4 = smov 32   ;;  %s3052_s22 = smov 2  }
  0x2f   :  { %33 = dma.hbm_to_vmem [thread:$0]  %s3588_s0, 128, %s28_s20, [#allocation3], %s3051_s4, %s3051_s4, %s3052_s22  }
  0x30   :  { %s3053_s27 = smov [#allocation7]  }
  0x31   :  { %s51_s28 = sshll.u32 %s3053_s27, 4  ;;  %s52_s28 = int_to_ptr.vmem [resolvable:$true] %s51_s28 }
  0x32   :  { %s2963_s6 = scalar_lea.vmem %s52_s28, 64  ;;  %p2968_p7 = scmp.lt.s32.totalorder %s52_s28, %s52_s28 }
  0x33   :  { %p2964_p6 = scmp.ne.s32.totalorder %s52_s28, %s2963_s6  ;;  %p2969_p8 = scmp.lt.s32.totalorder %s2963_s6, %s2963_s6 }
  0x35   :  { %p2970_p9 = por %p2969_p8, %p2968_p7 }
  0x37   :  { %p2971_p10 = pnand %p2970_p9, %p2964_p6 }
  0x39   :  { %2974 = shalt.err (!%p2971_p10)
}
  0x3a   :  { %s3054_s29 = smov 16   ;;  %s3055_s30 = smov 1  }
  0x3b   :  { %57 = dma.hbm_to_vmem [thread:$0]  %s3590_s2, 64, %s52_s28, [#allocation6], %s3054_s29, %s3054_s29, %s3055_s30  }
  0x3c   :  { %s3056_s15 = smov [#allocation10]   ;;  %s3057_s16 = smov [#allocation13]  }
  0x3d   :  { %s77_s0 = sshll.u32 %s3056_s15, 4  ;;  %s101_s1 = sshll.u32 %s3057_s16, 4  ;;  %s78_s0 = int_to_ptr.vmem [resolvable:$true] %s77_s0  ;;  %s102_s1 = int_to_ptr.vmem [resolvable:$true] %s101_s1 }
  0x3e   :  { %s2983_s17 = scalar_lea.vmem %s78_s0, 256  ;;  %p2988_p12 = scmp.lt.s32.totalorder %s78_s0, %s78_s0 }
  0x3f   :  { %p2984_p11 = scmp.ne.s32.totalorder %s78_s0, %s2983_s17  ;;  %p2989_p13 = scmp.lt.s32.totalorder %s2983_s17, %s2983_s17 }
  0x41   :  { %p2990_p0 = por %p2989_p13, %p2988_p12 }
  0x43   :  { %p2991_p1 = pnand %p2990_p0, %p2984_p11 }
  0x45   :  { %2994 = shalt.err (!%p2991_p1)
}
  0x46   :  { %83 = dma.hbm_to_vmem [thread:$0]  %s3593_s5, 256, %s78_s0, [#allocation9], %s3046_s24, %s3046_s24, %s3047_s25  }
  0x47   :  { %s3003_s2 = scalar_lea.vmem %s102_s1, 256  ;;  %p3008_p3 = scmp.lt.s32.totalorder %s102_s1, %s102_s1 }
  0x48   :  { %p3004_p2 = scmp.ne.s32.totalorder %s102_s1, %s3003_s2  ;;  %p3009_p4 = scmp.lt.s32.totalorder %s3003_s2, %s3003_s2 }
  0x4a   :  { %p3010_p5 = por %p3009_p4, %p3008_p3 }
  0x4c   :  { %p3011_p6 = pnand %p3010_p5, %p3004_p2 }
  0x4e   :  { %3014 = shalt.err (!%p3011_p6)
}
  0x4f   :  { %107 = dma.hbm_to_vmem [thread:$0]  %s3595_s7, 256, %s102_s1, [#allocation12], %s3046_s24, %s3046_s24, %s3047_s25  }
  0x50   :  { %3035 = dma.done.wait [#allocation3], 128  }
  0x51   :  { %3036 = vsyncadd [#allocation3], 4294967168 }
  0x52   :  { %3037 = dma.done.wait [#allocation6], 320  }
  0x53   :  { %3038 = vsyncadd [#allocation6], 4294966976 }
  0x54   :  { %3039 = dma.done.wait [#allocation9], 512  }
  0x55   :  { %3040 = vsyncadd [#allocation9], 4294966784 }
  0x56   :  { %3041 = dma.done.wait [#allocation12], 512  }
  0x57   :  { %3042 = vsyncadd [#allocation12], 4294966784  ;;  %v3058_v0 = vmov 0.0   ;;  %vm3059_vm0 = vmmov 0   ;;  %v3060_v1 = vmov 1983009808   ;;  %v166_v3 = vlaneseq }
  0x58   :  { %2555 = vmatprep.subr.bf16.mxu0 %v3058_v0  ;;  %2559 = vmatprep.mubr.msk.bf16.mxu0 %vm3059_vm0, %v3058_v0  ;;  %v164_v2 = vunpack.c.l.s4 %v3060_v1  ;;  %v2801_v4 = vld [vmem:[#allocation10 + $0x8] sm:$0xff]   ;;  %v2802_v5 = vld [vmem:[#allocation10] sm:$0xff]   ;;  %v2803_v8 = vld [vmem:[#allocation8 + $0x8] sm:$0xff]   ;;  %vm190_vm1 = vcmask 261120   ;;  %vm461_vm2 = vcmask 64512   ;;  %vm698_vm3 = vcmask 1043456  }
  0x59   :  { %v167_v7 = vshrl.u32 %v166_v3, 7  ;;  %2563 = vmatprep.subr.bf16.mxu1 %v2801_v4  ;;  %v2804_v9 = vld [vmem:[#allocation5] sm:$0xff]   ;;  %2556 = vmatpush3.bf16.msra.mxu0 %v2803_v8  ;;  %v2805_v10 = vld [vmem:[#allocation5 + $0x8] sm:$0xff]   ;;  %v2806_v11 = vld [vmem:[#allocation8] sm:$0xff]   ;;  %vm646_vm4 = vcmask 60416   ;;  %s3062_s23 = smov 112  }
  0x5a   :  { %v165_v6 = vunpack.c.0.s8 %v164_v2  ;;  %2564 = vmatpush3.bf16.msra.mxu1 %v2801_v4  ;;  %2567 = vmatprep.mubr.msk.bf16.mxu1 %vm190_vm1, %v2804_v9  ;;  %v138_v13 = vld [vmem:[#allocation2] sm:$0x3]  ;;  %v139_v14 = vld [vmem:[#allocation2 + $0x2] sm:$0x3]  ;;  %v140_v15 = vld [vmem:[#allocation2 + $0x4] sm:$0x3] }
  0x5b   :  { %2565 = vmatprep.subr.bf16.mxu1 %v2802_v5  ;;  %2557 = vmatprep.subr.bf16.mxu0 %v3058_v0  ;;  %v141_v16 = vld [vmem:[#allocation2 + $0x6] sm:$0x3]  ;;  %v161_v17 = vcombine.low %v138_v13, %v139_v14  ;;  %v2808_v23 = vld [vmem:[#allocation11] sm:$0xff]   ;;  %v3252_v4 = vld [vmem:[#allocation7] ss:$0 sm:$0xff]  ;;  %s3063_s26 = smov 104  }
  0x5c   :  { %v168_v12 = vsub.s32 %v165_v6, %v167_v7  ;;  %v162_v18 = vcombine.low %v140_v15, %v141_v16  ;;  %v2807_v19 = vld [vmem:[#allocation11 + $0x8] sm:$0xff]   ;;  %v2405_v25 = vld [vmem:[%s3597_s9] ss:$0 sm:$0xff]  ;;  %v3255_v7 = vld [vmem:[#allocation7 + $0x1] ss:$0 sm:$0xff]  ;;  %s3064_s27 = smov 8  }
  0x5d   :  { %2558 = vmatpush3.bf16.msra.mxu0 %v2806_v11  ;;  %v2401_v31 = vld [vmem:[%s3596_s8] ss:$0 sm:$0xff]  ;;  %v3259_v15 = vld [vmem:[#allocation7 + $0x2] ss:$0 sm:$0xff]  ;;  %s3065_s28 = smov 24   ;;  %vm2256_vm5 = vcmask 130048  }
  0x5e   :  { %2566 = vmatpush3.bf16.msra.mxu1 %v2802_v5  ;;  %v169_v20 = vrot.slane %v161_v17, %v168_v12  ;;  %v176_v21 = vrot.slane %v162_v18, %v168_v12  ;;  %2571 = vmatprep.subr.bf16.mxu0 %v2807_v19  ;;  %v2412_v54 = vld [vmem:[%s3598_s10] ss:$0 sm:$0xff]  ;;  %s3061_s10 = smov 120   ;;  %vm2261_vm6 = vcmask 195584   ;;  %vm2376_vm7 = vcmask 257024   ;;  %s3066_s17 = smov [#allocation14]  }
  0x5f   :  { %2579 = vmatprep.subr.bf16.mxu1 %v3058_v0  ;;  %s2386_s18 = sshll.u32 %s3066_s17, 4  ;;  %s2387_s18 = int_to_ptr.vmem [resolvable:$true] %s2386_s18 }
  0x60   :  { %v177_v22 = vcombine.low %v169_v20, %v176_v21  ;;  %v3263_v21 = vld [vmem:[#allocation7 + $0x3] ss:$0 sm:$0xff]  ;;  %s3015_s19 = scalar_lea.vmem %s2387_s18, 256  ;;  %p3020_p8 = scmp.lt.s32.totalorder %s2387_s18, %s2387_s18 }
  0x61   :  { %2568 = vmatmul.mubr.msk.bf16.vlgmr.msra.gmra.mxu1 %vm190_vm1, %v2805_v10  ;;  %p3016_p7 = scmp.ne.s32.totalorder %s2387_s18, %s3015_s19  ;;  %p3021_p9 = scmp.lt.s32.totalorder %s3015_s19, %s3015_s19 }
  0x62   :  { %2581 = vmatprep.mubr.msk.bf16.mxu1 %vm3059_vm0, %v3058_v0  ;;  %2560 = vmatmul.mubr.msk.bf16.vlgmr.msra.gmra.mxu0 %vm190_vm1, %v177_v22 }
  0x63   :  { %2572 = vmatpush3.bf16.msra.mxu0 %v2807_v19  ;;  %2575 = vmatprep.mubr.msk.bf16.mxu0 %vm190_vm1, %v2804_v9  ;;  %p3022_p10 = por %p3021_p9, %p3020_p8 }
  0x64   :  { %2573 = vmatprep.subr.bf16.mxu0 %v2808_v23 }
  0x65   :  { %p3023_p11 = pnand %p3022_p10, %p3016_p7 }
  0x67   :  { %2574 = vmatpush3.bf16.msra.mxu0 %v2808_v23 }
  0x68   :  { %2585 = vmatprep.subr.bf16.mxu0 %v3058_v0 }
  0x6a   :  { %2576 = vmatmul.mubr.msk.bf16.vlgmr.msra.gmra.mxu0 %vm190_vm1, %v2805_v10 }
  0x6b   :  { %2587 = vmatprep.mubr.msk.bf16.mxu0 %vm3059_vm0, %v3058_v0 }
 0x121   :  { %v2569_v24 = vpop.f32.mrf.mxu1 }
 0x122   :  { %v228_v29 = vpop.f32.mrf.mxu0  ;;  %v317_v35 = vadd.f32 %v2569_v24, %v2405_v25 }
 0x123   :  { %v308_v26 = vpop.f32.mrf.mxu1  ;;  %v229_v36 = vadd.f32 %v2401_v31, %v228_v29 }
 0x124   :  { %v309_v27 = vadd.f32 %v2405_v25, %v308_v26  ;;  %v2561_v33 = vpop.f32.mrf.mxu0  ;;  %v3200_v43 = vpack.c.bf16 %v317_v35, %v317_v35 }
 0x125   :  { %v2570_v28 = vpop.f32.mrf.mxu1  ;;  %v3202_v44 = vpack.c.bf16 %v229_v36, %v229_v36  ;;  %v401_v45 = vcombine.high %v229_v36, %v229_v36 }
 0x126   :  { %v3188_v30 = vpack.c.bf16 %v309_v27, %v309_v27  ;;  %v231_v38 = vpop.f32.mrf.mxu0  ;;  %v320_v41 = vadd.f32 %v2570_v28, %v2405_v25  ;;  %v558_v47 = vsel %vm461_vm2, %v3200_v43, 0 }
 0x127   :  { %v311_v32 = vpop.f32.mrf.mxu1  ;;  %v3211_v48 = vpack.c.bf16 %v401_v45, %v401_v45  ;;  %v232_v49 = vadd.f32 %v2401_v31, %v231_v38 }
 0x128   :  { %v312_v34 = vadd.f32 %v2405_v25, %v311_v32  ;;  %v466_v37 = vsel %vm461_vm2, %v3188_v30, 0  ;;  %v2562_v40 = vpop.f32.mrf.mxu0  ;;  %v3205_v46 = vpack.c.bf16 %v320_v41, %v320_v41 }
 0x129   :  { %2580 = vmatpush3.bf16.xpose.msra.mxu1 %v466_v37  ;;  %v402_v51 = vcombine.high %v232_v49, %v232_v49  ;;  %v3223_v52 = vpack.c.bf16 %v232_v49, %v232_v49 }
 0x12a   :  { %v3195_v39 = vpack.c.bf16 %v312_v34, %v312_v34  ;;  %2591 = vmatprep.subr.bf16.mxu1 %v3058_v0  ;;  %v604_v50 = vsel %vm461_vm2, %v3205_v46, 0  ;;  %v2577_v55 = vpop.f32.mrf.mxu0 }
 0x12b   :  { %v3227_v53 = vpack.c.bf16 %v402_v51, %v402_v51  ;;  %v3238_v56 = vadd.f32 %v2577_v55, %v2412_v54 }
 0x12c   :  { %v512_v42 = vsel %vm461_vm2, %v3195_v39, 0  ;;  %v382_v57 = vpop.f32.mrf.mxu0 }
 0x12d   :  { %2586 = vmatpush3.bf16.xpose.msra.mxu0 %v512_v42  ;;  %v383_v58 = vadd.f32 %v2412_v54, %v382_v57 }
 0x12e   :  { %2597 = vmatprep.subr.bf16.mxu0 %v3058_v0  ;;  %v2578_v59 = vpop.f32.mrf.mxu0 }
 0x12f   :  { %v3240_v60 = vadd.f32 %v2578_v59, %v2412_v54  ;;  %v3242_v63 = vpack.c.bf16 %v383_v58, %v383_v58 }
 0x130   :  { %2582 = vmatmul.mubr.msk.bf16.vlgmr.msra.gmra.mxu1 %vm461_vm2, %v3202_v44  ;;  %v385_v61 = vpop.f32.mrf.mxu0 }
 0x131   :  { %2592 = vmatpush3.bf16.xpose.msra.mxu1 %v558_v47  ;;  %2593 = vmatprep.mubr.msk.bf16.mxu1 %vm3059_vm0, %v3058_v0  ;;  %v386_v62 = vadd.f32 %v2412_v54, %v385_v61  ;;  %v700_v2 = vsel %vm698_vm3, %v3242_v63, 0 }
 0x132   :  { %2603 = vmatprep.subr.bf16.mxu1 %v3058_v0 }
 0x133   :  { %v3244_v1 = vpack.c.bf16 %v386_v62, %v386_v62 }
 0x134   :  { %2588 = vmatmul.mubr.msk.bf16.vlgmr.msra.gmra.mxu0 %vm461_vm2, %v3211_v48 }
 0x135   :  { %2598 = vmatpush3.bf16.xpose.msra.mxu0 %v604_v50  ;;  %2599 = vmatprep.mubr.msk.bf16.mxu0 %vm3059_vm0, %v3058_v0  ;;  %v746_v3 = vsel %vm698_vm3, %v3244_v1, 0 }
 0x136   :  { %2609 = vmatprep.subr.bf16.mxu0 %v3058_v0 }
 0x138   :  { %2594 = vmatmul.mubr.msk.bf16.vlgmr.msra.gmra.mxu1 %vm461_vm2, %v3223_v52 }
 0x139   :  { %2605 = vmatprep.mubr.msk.bf16.mxu1 %vm3059_vm0, %v3058_v0  ;;  %2604 = vmatpush3.bf16.msra.mxu1 %v700_v2 }
 0x13a   :  { %2615 = vmatprep.subr.bf16.mxu1 %v3058_v0 }
 0x13c   :  { %2600 = vmatmul.mubr.msk.bf16.vlgmr.msra.gmra.mxu0 %vm461_vm2, %v3227_v53 }
 0x13d   :  { %2611 = vmatprep.mubr.msk.bf16.mxu0 %vm3059_vm0, %v3058_v0  ;;  %2610 = vmatpush3.bf16.msra.mxu0 %v746_v3 }
 0x13e   :  { %2621 = vmatprep.subr.bf16.mxu0 %v3058_v0 }
 0x1f0   :  { %v502_v5 = vpop.f32.mrf.mxu1 }
 0x1f1   :  { %v503_v6 = vadd.f32 %v3252_v4, %v502_v5 }
 0x1f2   :  { %v2583_v8 = vpop.f32.mrf.mxu1 }
 0x1f3   :  { %v647_v9 = vsel %vm646_vm4, %v503_v6, -inf }
 0x1f4   :  { %v548_v10 = vpop.f32.mrf.mxu0  ;;  %648 = vmax.xlane.f32.xlu0 %v647_v9  ;;  %v505_v11 = vpop.f32.mrf.mxu1 }
 0x1f5   :  { %v549_v12 = vadd.f32 %v3255_v7, %v548_v10  ;;  %v3294_v11 = vpack.c.bf16 %v3240_v60, %v3240_v60 }
 0x1f6   :  { %v2589_v13 = vpop.f32.mrf.mxu0  ;;  %v2584_v14 = vpop.f32.mrf.mxu1 }
 0x1f7   :  { %v650_v16 = vsel %vm646_vm4, %v549_v12, -inf  ;;  %v838_v60 = vsel %vm698_vm3, %v3294_v11, 0 }
 0x1f8   :  { %v551_v17 = vpop.f32.mrf.mxu0  ;;  %v594_v18 = vpop.f32.mrf.mxu1  ;;  %651 = vmax.xlane.f32.xlu0 %v650_v16 }
 0x1f9   :  { %v595_v19 = vadd.f32 %v3259_v15, %v594_v18 }
 0x1fa   :  { %v2590_v20 = vpop.f32.mrf.mxu0  ;;  %v2595_v22 = vpop.f32.mrf.mxu1 }
 0x1fb   :  { %v653_v23 = vsel %vm646_vm4, %v595_v19, -inf }
 0x1fc   :  { %v640_v24 = vpop.f32.mrf.mxu0  ;;  %654 = vmax.xlane.f32.xlu1 %v653_v23  ;;  %v597_v25 = vpop.f32.mrf.mxu1 }
 0x1fd   :  { %v641_v26 = vadd.f32 %v3263_v21, %v640_v24 }
 0x1fe   :  { %v2601_v27 = vpop.f32.mrf.mxu0  ;;  %v2596_v28 = vpop.f32.mrf.mxu1 }
 0x1ff   :  { %v656_v29 = vsel %vm646_vm4, %v641_v26, -inf }
 0x200   :  { %v643_v31 = vpop.f32.mrf.mxu0  ;;  %657 = vmax.xlane.f32.xlu1 %v656_v29 }
 0x202   :  { %v2602_v32 = vpop.f32.mrf.mxu0 }
 0x27d   :  { %v649_v33 = vpop.xlane.xlu0 %648 }
 0x27e   :  { %v659_v34 = vsub.f32 %v503_v6, %v649_v33  ;;  %v3290_v6 = vpack.c.bf16 %v3238_v56, %v3238_v56 }
 0x280   :  { %v663_v35 = vmul.f32 1.442695, %v659_v34 }
 0x281   :  { %v652_v36 = vpop.xlane.xlu0 %651 }
 0x282   :  { %2811 = vpow2.f32 %v663_v35  ;;  %v660_v37 = vsub.f32 %v549_v12, %v652_v36  ;;  %v792_v12 = vsel %vm698_vm3, %v3290_v6, 0 }
 0x284   :  { %v665_v38 = vmul.f32 1.442695, %v660_v37 }
 0x285   :  { %v655_v40 = vpop.xlane.xlu1 %654 }
 0x286   :  { %2813 = vpow2.f32 %v665_v38  ;;  %v661_v41 = vsub.f32 %v595_v19, %v655_v40 }
 0x288   :  { %v667_v42 = vmul.f32 1.442695, %v661_v41 }
 0x289   :  { %v658_v55 = vpop.xlane.xlu1 %657 }
 0x28a   :  { %2815 = vpow2.f32 %v667_v42  ;;  %v662_v57 = vsub.f32 %v641_v26, %v658_v55 }
 0x28c   :  { %v669_v58 = vmul.f32 1.442695, %v662_v57 }
 0x28e   :  { %2817 = vpow2.f32 %v669_v58 }
 0x28f   :  { %v2812_v45 = vpop.eup %2811 }
 0x290   :  { %v671_v47 = vsel %vm646_vm4, %v2812_v45, 0.0 }
 0x291   :  { %672 = vadd.xlane.f32.xlu0 %v671_v47 }
 0x293   :  { %v2814_v49 = vpop.eup %2813 }
 0x294   :  { %v674_v50 = vsel %vm646_vm4, %v2814_v49, 0.0 }
 0x295   :  { %675 = vadd.xlane.f32.xlu1 %v674_v50 }
 0x297   :  { %v2816_v51 = vpop.eup %2815 }
 0x298   :  { %v677_v54 = vsel %vm646_vm4, %v2816_v51, 0.0 }
 0x299   :  { %678 = vadd.xlane.f32.xlu0 %v677_v54 }
 0x29b   :  { %v2818_v59 = vpop.eup %2817 }
 0x29c   :  { %v680_v61 = vsel %vm646_vm4, %v2818_v59, 0.0 }
 0x2a6   :  { %934 = vrot.lane.b32.xlu1 %v3195_v39, %s3061_s10 }
 0x2aa   :  { %881 = vrot.lane.b32.xlu1 %v3202_v44, %s3061_s10 }
 0x2af   :  { %883 = vrot.lane.b32.xlu0 %v3188_v30, %s3061_s10 }
 0x2b3   :  { %985 = vrot.lane.b32.xlu0 %v3200_v43, %s3061_s10 }
 0x2b7   :  { %983 = vrot.lane.b32.xlu0 %v3223_v52, %s3061_s10 }
 0x2ce   :  { %681 = vadd.xlane.f32.xlu1 %v680_v61 }
 0x2df   :  { %932 = vrot.lane.b32.xlu1 %v3211_v48, %s3061_s10 }
 0x2e3   :  { %1036 = vrot.lane.b32.xlu1 %v3205_v46, %s3061_s10 }
 0x2e7   :  { %1034 = vrot.lane.b32.xlu1 %v3227_v53, %s3061_s10 }
 0x31a   :  { %v673_v62 = vpop.xlane.xlu0 %672 }
 0x31b   :  { %2819 = vrcp.f32 %v673_v62 }
 0x31e   :  { %v676_v2 = vpop.xlane.xlu1 %675 }
 0x31f   :  { %2821 = vrcp.f32 %v676_v2 }
 0x322   :  { %v679_v3 = vpop.xlane.xlu0 %678  ;;  %v935_v20 = vpop.permute.xlu1 %934 }
 0x323   :  { %2823 = vrcp.f32 %v679_v3  ;;  %v940_v32 = vsel %vm461_vm2, %v935_v20, 0 }
 0x326   :  { %v884_v17 = vpop.permute.xlu0 %883  ;;  %v882_v23 = vpop.permute.xlu1 %881 }
 0x327   :  { %v889_v19 = vsel %vm461_vm2, %v884_v17, 0 }
 0x328   :  { %v2820_v5 = vpop.eup %2819 }
 0x329   :  { %v687_v8 = vmul.f32 %v2820_v5, %v2812_v45 }
 0x32a   :  { %v986_v22 = vpop.permute.xlu0 %985 }
 0x32b   :  { %v691_v9 = vpack.c.bf16 %v687_v8, %v687_v8  ;;  %v991_v24 = vsel %vm461_vm2, %v986_v22, 0 }
 0x32c   :  { %v2822_v10 = vpop.eup %2821 }
 0x32d   :  { %2606 = vmatmul.mubr.msk.bf16.vlgmr.msra.gmra.mxu1 %vm461_vm2, %v691_v9  ;;  %v688_v13 = vmul.f32 %v2822_v10, %v2814_v49 }
 0x32e   :  { %2616 = vmatpush3.bf16.msra.mxu1 %v792_v12  ;;  %2617 = vmatprep.mubr.msk.bf16.mxu1 %vm3059_vm0, %v3058_v0  ;;  %v984_v25 = vpop.permute.xlu0 %983 }
 0x32f   :  { %v692_v14 = vpack.c.bf16 %v688_v13, %v688_v13  ;;  %2627 = vmatprep.subr.bf16.mxu1 %v3058_v0 }
 0x330   :  { %v2824_v56 = vpop.eup %2823 }
 0x331   :  { %2612 = vmatmul.mubr.msk.bf16.vlgmr.msra.gmra.mxu0 %vm461_vm2, %v692_v14  ;;  %v689_v16 = vmul.f32 %v2824_v56, %v2816_v51 }
 0x332   :  { %2622 = vmatpush3.bf16.msra.mxu0 %v838_v60  ;;  %2623 = vmatprep.mubr.msk.bf16.mxu0 %vm3059_vm0, %v3058_v0 }
 0x333   :  { %v693_v18 = vpack.c.bf16 %v689_v16, %v689_v16  ;;  %2633 = vmatprep.subr.bf16.mxu0 %v3058_v0 }
 0x335   :  { %2618 = vmatmul.mubr.msk.bf16.vlgmr.msra.gmra.mxu1 %vm461_vm2, %v693_v18 }
 0x336   :  { %2628 = vmatpush3.bf16.xpose.msra.mxu1 %v889_v19  ;;  %2629 = vmatprep.mubr.msk.bf16.mxu1 %vm3059_vm0, %v3058_v0 }
 0x337   :  { %2639 = vmatprep.subr.bf16.mxu1 %v3058_v0 }
 0x33d   :  { %2630 = vmatmul.mubr.msk.bf16.vlgmr.msra.gmra.mxu1 %vm461_vm2, %v882_v23 }
 0x33e   :  { %2640 = vmatpush3.bf16.xpose.msra.mxu1 %v991_v24  ;;  %2641 = vmatprep.mubr.msk.bf16.mxu1 %vm3059_vm0, %v3058_v0 }
 0x33f   :  { %2651 = vmatprep.subr.bf16.mxu1 %v3058_v0 }
 0x345   :  { %2642 = vmatmul.mubr.msk.bf16.vlgmr.msra.gmra.mxu1 %vm461_vm2, %v984_v25 }
 0x346   :  { %2653 = vmatprep.mubr.msk.bf16.mxu1 %vm3059_vm0, %v3058_v0 }
 0x357   :  { %v682_v26 = vpop.xlane.xlu1 %681 }
 0x358   :  { %2825 = vrcp.f32 %v682_v26 }
 0x35b   :  { %v933_v31 = vpop.permute.xlu1 %932 }
 0x35f   :  { %v1037_v33 = vpop.permute.xlu1 %1036 }
 0x360   :  { %v1042_v34 = vsel %vm461_vm2, %v1037_v33, 0 }
 0x363   :  { %v1035_v35 = vpop.permute.xlu1 %1034 }
 0x365   :  { %v2826_v27 = vpop.eup %2825 }
 0x366   :  { %v690_v28 = vmul.f32 %v2826_v27, %v2818_v59 }
 0x368   :  { %v694_v29 = vpack.c.bf16 %v690_v28, %v690_v28 }
 0x36a   :  { %2624 = vmatmul.mubr.msk.bf16.vlgmr.msra.gmra.mxu0 %vm461_vm2, %v694_v29 }
 0x36b   :  { %2634 = vmatpush3.bf16.xpose.msra.mxu0 %v940_v32  ;;  %2635 = vmatprep.mubr.msk.bf16.mxu0 %vm3059_vm0, %v3058_v0 }
 0x36c   :  { %2645 = vmatprep.subr.bf16.mxu0 %v3058_v0 }
 0x372   :  { %2636 = vmatmul.mubr.msk.bf16.vlgmr.msra.gmra.mxu0 %vm461_vm2, %v933_v31 }
 0x373   :  { %2646 = vmatpush3.bf16.xpose.msra.mxu0 %v1042_v34  ;;  %2647 = vmatprep.mubr.msk.bf16.mxu0 %vm3059_vm0, %v3058_v0 }
 0x374   :  { %2657 = vmatprep.subr.bf16.mxu0 %v3058_v0 }
 0x37a   :  { %2648 = vmatmul.mubr.msk.bf16.vlgmr.msra.gmra.mxu0 %vm461_vm2, %v1035_v35 }
 0x37b   :  { %2659 = vmatprep.mubr.msk.bf16.mxu0 %vm3059_vm0, %v3058_v0 }
 0x3ed   :  { %v3334_v36 = vpop.f32.mrf.mxu1 }
 0x3ef   :  { %v2607_v37 = vpop.f32.mrf.mxu1 }
 0x3f1   :  { %v739_v38 = vpop.f32.mrf.mxu1  ;;  %v3336_v40 = vpop.f32.mrf.mxu0 }
 0x3f3   :  { %v2608_v41 = vpop.f32.mrf.mxu1  ;;  %v2613_v42 = vpop.f32.mrf.mxu0 }
 0x3f5   :  { %v785_v45 = vpop.f32.mrf.mxu0  ;;  %v3338_v47 = vpop.f32.mrf.mxu1 }
 0x3f7   :  { %v2614_v49 = vpop.f32.mrf.mxu0  ;;  %v2619_v50 = vpop.f32.mrf.mxu1 }
 0x3f9   :  { %v831_v51 = vpop.f32.mrf.mxu1 }
 0x3fb   :  { %v2620_v54 = vpop.f32.mrf.mxu1 }
 0x3fd   :  { %v925_v55 = vpop.f32.mrf.mxu1 }
 0x3fe   :  { %v926_v57 = vadd.f32 %v3252_v4, %v925_v55 }
 0x3ff   :  { %v2631_v58 = vpop.f32.mrf.mxu1 }
 0x400   :  { %v1084_v59 = vsel %vm646_vm4, %v926_v57, -inf }
 0x401   :  { %1085 = vmax.xlane.f32.xlu0 %v1084_v59  ;;  %v928_v61 = vpop.f32.mrf.mxu1 }
 0x403   :  { %v2632_v62 = vpop.f32.mrf.mxu1 }
 0x405   :  { %v1027_v2 = vpop.f32.mrf.mxu1 }
 0x406   :  { %v1028_v3 = vadd.f32 %v3259_v15, %v1027_v2 }
 0x407   :  { %v2643_v5 = vpop.f32.mrf.mxu1 }
 0x408   :  { %v1090_v8 = vsel %vm646_vm4, %v1028_v3, -inf }
 0x409   :  { %1091 = vmax.xlane.f32.xlu0 %v1090_v8  ;;  %v1030_v9 = vpop.f32.mrf.mxu1 }
 0x40b   :  { %v2644_v10 = vpop.f32.mrf.mxu1 }
 0x42a   :  { %v3344_v12 = vpop.f32.mrf.mxu0 }
 0x42c   :  { %v2625_v13 = vpop.f32.mrf.mxu0 }
 0x42e   :  { %v877_v14 = vpop.f32.mrf.mxu0 }
 0x430   :  { %v2626_v56 = vpop.f32.mrf.mxu0 }
 0x432   :  { %v976_v60 = vpop.f32.mrf.mxu0 }
 0x433   :  { %v977_v16 = vadd.f32 %v3255_v7, %v976_v60 }
 0x434   :  { %v2637_v17 = vpop.f32.mrf.mxu0 }
 0x435   :  { %v1087_v18 = vsel %vm646_vm4, %v977_v16, -inf }
 0x436   :  { %1088 = vmax.xlane.f32.xlu1 %v1087_v18  ;;  %v979_v19 = vpop.f32.mrf.mxu0 }
 0x438   :  { %v2638_v20 = vpop.f32.mrf.mxu0 }
 0x43a   :  { %v1078_v22 = vpop.f32.mrf.mxu0 }
 0x43b   :  { %v1079_v23 = vadd.f32 %v3263_v21, %v1078_v22 }
 0x43c   :  { %v2649_v24 = vpop.f32.mrf.mxu0 }
 0x43d   :  { %v1093_v25 = vsel %vm646_vm4, %v1079_v23, -inf }
 0x43e   :  { %v1081_v26 = vpop.f32.mrf.mxu0  ;;  %1094 = vmax.xlane.f32.xlu0 %v1093_v25 }
 0x440   :  { %v2650_v27 = vpop.f32.mrf.mxu0 }
 0x447   :  { %1180 = vrot.lane.b32.xlu1 %v3244_v1, %s3061_s10 }
 0x44b   :  { %1228 = vrot.lane.b32.xlu1 %v3290_v6, %s3061_s10 }
 0x44f   :  { %1276 = vrot.lane.b32.xlu1 %v3294_v11, %s3061_s10 }
 0x48a   :  { %v1086_v28 = vpop.xlane.xlu0 %1085 }
 0x48b   :  { %v1096_v29 = vsub.f32 %v926_v57, %v1086_v28 }
 0x48d   :  { %v1100_v31 = vmul.f32 1.442695, %v1096_v29 }
 0x48f   :  { %2827 = vpow2.f32 %v1100_v31 }
 0x492   :  { %v1092_v34 = vpop.xlane.xlu0 %1091 }
 0x493   :  { %v1098_v35 = vsub.f32 %v1028_v3, %v1092_v34 }
 0x495   :  { %v1104_v37 = vmul.f32 1.442695, %v1098_v35 }
 0x497   :  { %2829 = vpow2.f32 %v1104_v37 }
 0x49c   :  { %v2828_v32 = vpop.eup %2827 }
 0x49d   :  { %v1108_v33 = vsel %vm646_vm4, %v2828_v32, 0.0 }
 0x49e   :  { %1109 = vadd.xlane.f32.xlu0 %v1108_v33 }
 0x4a4   :  { %v2830_v50 = vpop.eup %2829 }
 0x4a5   :  { %v1114_v55 = vsel %vm646_vm4, %v2830_v50, 0.0 }
 0x4b4   :  { %1132 = vrot.lane.b32.xlu0 %v3242_v63, %s3061_s10 }
 0x4bf   :  { %v1089_v38 = vpop.xlane.xlu1 %1088 }
 0x4c0   :  { %v1097_v41 = vsub.f32 %v977_v16, %v1089_v38 }
 0x4c2   :  { %v1102_v42 = vmul.f32 1.442695, %v1097_v41 }
 0x4c3   :  { %v1181_v45 = vpop.permute.xlu1 %1180 }
 0x4c4   :  { %2831 = vpow2.f32 %v1102_v42  ;;  %v1186_v49 = vsel %vm698_vm3, %v1181_v45, 0 }
 0x4c5   :  { %2658 = vmatpush3.bf16.msra.mxu0 %v1186_v49 }
 0x4c6   :  { %2669 = vmatprep.subr.bf16.mxu0 %v3058_v0 }
 0x4c7   :  { %v1095_v57 = vpop.xlane.xlu0 %1094  ;;  %v1229_v10 = vpop.permute.xlu1 %1228 }
 0x4c8   :  { %v1099_v58 = vsub.f32 %v1079_v23, %v1095_v57  ;;  %v1234_v14 = vsel %vm698_vm3, %v1229_v10, 0 }
 0x4ca   :  { %v1106_v59 = vmul.f32 1.442695, %v1099_v58 }
 0x4cb   :  { %v1277_v56 = vpop.permute.xlu1 %1276 }
 0x4cc   :  { %2833 = vpow2.f32 %v1106_v59  ;;  %v1282_v25 = vsel %vm698_vm3, %v1277_v56, 0 }
 0x4d1   :  { %v2832_v51 = vpop.eup %2831 }
 0x4d2   :  { %v1111_v54 = vsel %vm646_vm4, %v2832_v51, 0.0 }
 0x4d3   :  { %1112 = vadd.xlane.f32.xlu1 %v1111_v54  ;;  %1115 = vadd.xlane.f32.xlu0 %v1114_v55 }
 0x4d9   :  { %v2834_v61 = vpop.eup %2833 }
 0x4da   :  { %v1117_v62 = vsel %vm646_vm4, %v2834_v61, 0.0 }
 0x4e4   :  { %1376 = vrot.lane.b32.xlu1 %v3195_v39, %s3062_s23 }
 0x4e9   :  { %1326 = vrot.lane.b32.xlu0 %v3188_v30, %s3062_s23 }
 0x4ed   :  { %1324 = vrot.lane.b32.xlu0 %v3202_v44, %s3062_s23 }
 0x4f1   :  { %1426 = vrot.lane.b32.xlu0 %v3200_v43, %s3062_s23 }
 0x4f5   :  { %1424 = vrot.lane.b32.xlu0 %v3223_v52, %s3062_s23 }
 0x508   :  { %1118 = vadd.xlane.f32.xlu1 %v1117_v62 }
 0x519   :  { %1374 = vrot.lane.b32.xlu1 %v3211_v48, %s3062_s23 }
 0x51d   :  { %1476 = vrot.lane.b32.xlu1 %v3205_v46, %s3062_s23 }
 0x521   :  { %1474 = vrot.lane.b32.xlu1 %v3227_v53, %s3062_s23 }
 0x527   :  { %v1110_v2 = vpop.xlane.xlu0 %1109 }
 0x528   :  { %2835 = vrcp.f32 %v1110_v2 }
 0x52b   :  { %v1133_v3 = vpop.permute.xlu0 %1132 }
 0x52c   :  { %v1138_v5 = vsel %vm698_vm3, %v1133_v3, 0 }
 0x52d   :  { %2652 = vmatpush3.bf16.msra.mxu1 %v1138_v5 }
 0x52e   :  { %2663 = vmatprep.subr.bf16.mxu1 %v3058_v0 }
 0x535   :  { %v2836_v8 = vpop.eup %2835 }
 0x536   :  { %v1124_v9 = vmul.f32 %v2836_v8, %v2828_v32 }
 0x538   :  { %v1128_v13 = vpack.c.bf16 %v1124_v9, %v1124_v9 }
 0x53a   :  { %2654 = vmatmul.mubr.msk.bf16.vlgmr.msra.gmra.mxu1 %vm461_vm2, %v1128_v13 }
 0x53b   :  { %2664 = vmatpush3.bf16.msra.mxu1 %v1234_v14  ;;  %2665 = vmatprep.mubr.msk.bf16.mxu1 %vm3059_vm0, %v3058_v0 }
 0x53c   :  { %2675 = vmatprep.subr.bf16.mxu1 %v3058_v0 }
 0x55c   :  { %v1113_v60 = vpop.xlane.xlu1 %1112  ;;  %v1116_v16 = vpop.xlane.xlu0 %1115 }
 0x55d   :  { %2837 = vrcp.f32 %v1113_v60 }
 0x55e   :  { %2839 = vrcp.f32 %v1116_v16 }
 0x560   :  { %v1327_v17 = vpop.permute.xlu0 %1326  ;;  %v1377_v32 = vpop.permute.xlu1 %1376 }
 0x561   :  { %v1332_v27 = vsel %vm461_vm2, %v1327_v17, 0  ;;  %v1382_v41 = vsel %vm461_vm2, %v1377_v32, 0 }
 0x564   :  { %v1325_v26 = vpop.permute.xlu0 %1324 }
 0x568   :  { %v1427_v28 = vpop.permute.xlu0 %1426 }
 0x569   :  { %v1432_v29 = vsel %vm461_vm2, %v1427_v28, 0 }
 0x56a   :  { %v2838_v18 = vpop.eup %2837 }
 0x56b   :  { %v2840_v19 = vpop.eup %2839  ;;  %v1125_v20 = vmul.f32 %v2838_v18, %v2832_v51 }
 0x56c   :  { %v1126_v22 = vmul.f32 %v2840_v19, %v2830_v50  ;;  %v1425_v31 = vpop.permute.xlu0 %1424 }
 0x56d   :  { %v1129_v23 = vpack.c.bf16 %v1125_v20, %v1125_v20 }
 0x56e   :  { %v1130_v24 = vpack.c.bf16 %v1126_v22, %v1126_v22 }
 0x56f   :  { %2660 = vmatmul.mubr.msk.bf16.vlgmr.msra.gmra.mxu0 %vm461_vm2, %v1129_v23 }
 0x570   :  { %2666 = vmatmul.mubr.msk.bf16.vlgmr.msra.gmra.mxu1 %vm461_vm2, %v1130_v24  ;;  %2670 = vmatpush3.bf16.msra.mxu0 %v1282_v25 }
 0x571   :  { %2676 = vmatpush3.bf16.xpose.msra.mxu1 %v1332_v27  ;;  %2677 = vmatprep.mubr.msk.bf16.mxu1 %vm3059_vm0, %v3058_v0 }
 0x572   :  { %2687 = vmatprep.subr.bf16.mxu1 %v3058_v0  ;;  %2671 = vmatprep.mubr.msk.bf16.mxu0 %vm3059_vm0, %v3058_v0 }
 0x573   :  { %2681 = vmatprep.subr.bf16.mxu0 %v3058_v0 }
 0x578   :  { %2678 = vmatmul.mubr.msk.bf16.vlgmr.msra.gmra.mxu1 %vm461_vm2, %v1325_v26 }
 0x579   :  { %2688 = vmatpush3.bf16.xpose.msra.mxu1 %v1432_v29  ;;  %2689 = vmatprep.mubr.msk.bf16.mxu1 %vm3059_vm0, %v3058_v0 }
 0x57a   :  { %2699 = vmatprep.subr.bf16.mxu1 %v3058_v0 }
 0x580   :  { %2690 = vmatmul.mubr.msk.bf16.vlgmr.msra.gmra.mxu1 %vm461_vm2, %v1425_v31 }
 0x581   :  { %2701 = vmatprep.mubr.msk.bf16.mxu1 %vm3059_vm0, %v3058_v0 }
 0x591   :  { %v1119_v33 = vpop.xlane.xlu1 %1118 }
 0x592   :  { %2841 = vrcp.f32 %v1119_v33 }
 0x595   :  { %v1375_v38 = vpop.permute.xlu1 %1374 }
 0x599   :  { %v1477_v42 = vpop.permute.xlu1 %1476 }
 0x59a   :  { %v1482_v45 = vsel %vm461_vm2, %v1477_v42, 0 }
 0x59d   :  { %v1475_v49 = vpop.permute.xlu1 %1474 }
 0x59f   :  { %v2842_v34 = vpop.eup %2841 }
 0x5a0   :  { %v1127_v35 = vmul.f32 %v2842_v34, %v2834_v61 }
 0x5a2   :  { %v1131_v37 = vpack.c.bf16 %v1127_v35, %v1127_v35 }
 0x5a4   :  { %2672 = vmatmul.mubr.msk.bf16.vlgmr.msra.gmra.mxu0 %vm461_vm2, %v1131_v37 }
 0x5a5   :  { %2682 = vmatpush3.bf16.xpose.msra.mxu0 %v1382_v41  ;;  %2683 = vmatprep.mubr.msk.bf16.mxu0 %vm3059_vm0, %v3058_v0 }
 0x5a6   :  { %2693 = vmatprep.subr.bf16.mxu0 %v3058_v0 }
 0x5ac   :  { %2684 = vmatmul.mubr.msk.bf16.vlgmr.msra.gmra.mxu0 %vm461_vm2, %v1375_v38 }
 0x5ad   :  { %2694 = vmatpush3.bf16.xpose.msra.mxu0 %v1482_v45  ;;  %2695 = vmatprep.mubr.msk.bf16.mxu0 %vm3059_vm0, %v3058_v0 }
 0x5ae   :  { %2705 = vmatprep.subr.bf16.mxu0 %v3058_v0 }
 0x5b4   :  { %2696 = vmatmul.mubr.msk.bf16.vlgmr.msra.gmra.mxu0 %vm461_vm2, %v1475_v49 }
 0x5b5   :  { %2707 = vmatprep.mubr.msk.bf16.mxu0 %vm3059_vm0, %v3058_v0 }
 0x5fa   :  { %v3418_v50 = vpop.f32.mrf.mxu1 }
 0x5fc   :  { %v2655_v51 = vpop.f32.mrf.mxu1 }
 0x5fe   :  { %v1177_v54 = vpop.f32.mrf.mxu1 }
 0x600   :  { %v2656_v55 = vpop.f32.mrf.mxu1 }
 0x62f   :  { %v3420_v57 = vpop.f32.mrf.mxu0 }
 0x630   :  { %v3422_v58 = vpop.f32.mrf.mxu1 }
 0x631   :  { %v2661_v59 = vpop.f32.mrf.mxu0 }
 0x632   :  { %v2667_v61 = vpop.f32.mrf.mxu1 }
 0x633   :  { %v1225_v62 = vpop.f32.mrf.mxu0 }
 0x634   :  { %v1273_v2 = vpop.f32.mrf.mxu1 }
 0x635   :  { %v2662_v3 = vpop.f32.mrf.mxu0 }
 0x636   :  { %v2668_v5 = vpop.f32.mrf.mxu1 }
 0x638   :  { %v1368_v8 = vpop.f32.mrf.mxu1 }
 0x639   :  { %v1369_v9 = vadd.f32 %v3252_v4, %v1368_v8 }
 0x63a   :  { %v2679_v10 = vpop.f32.mrf.mxu1 }
 0x63b   :  { %v1524_v13 = vsel %vm646_vm4, %v1369_v9, -inf }
 0x63c   :  { %1525 = vmax.xlane.f32.xlu0 %v1524_v13  ;;  %v1371_v14 = vpop.f32.mrf.mxu1 }
 0x63e   :  { %v2680_v56 = vpop.f32.mrf.mxu1 }
 0x640   :  { %v1468_v60 = vpop.f32.mrf.mxu1 }
 0x641   :  { %v1469_v16 = vadd.f32 %v3259_v15, %v1468_v60 }
 0x642   :  { %v2691_v17 = vpop.f32.mrf.mxu1 }
 0x643   :  { %v1530_v18 = vsel %vm646_vm4, %v1469_v16, -inf }
 0x644   :  { %1531 = vmax.xlane.f32.xlu0 %v1530_v18  ;;  %v1471_v19 = vpop.f32.mrf.mxu1 }
 0x646   :  { %v2692_v20 = vpop.f32.mrf.mxu1 }
 0x664   :  { %v3428_v22 = vpop.f32.mrf.mxu0 }
 0x666   :  { %v2673_v23 = vpop.f32.mrf.mxu0 }
 0x668   :  { %v1321_v24 = vpop.f32.mrf.mxu0 }
 0x66a   :  { %v2674_v25 = vpop.f32.mrf.mxu0 }
 0x66c   :  { %v1418_v26 = vpop.f32.mrf.mxu0 }
 0x66d   :  { %v1419_v27 = vadd.f32 %v3255_v7, %v1418_v26 }
 0x66e   :  { %v2685_v28 = vpop.f32.mrf.mxu0 }
 0x66f   :  { %v1527_v29 = vsel %vm646_vm4, %v1419_v27, -inf }
 0x670   :  { %1528 = vmax.xlane.f32.xlu1 %v1527_v29  ;;  %v1421_v31 = vpop.f32.mrf.mxu0 }
 0x672   :  { %v2686_v32 = vpop.f32.mrf.mxu0 }
 0x674   :  { %v1518_v33 = vpop.f32.mrf.mxu0 }
 0x675   :  { %v1519_v34 = vadd.f32 %v3263_v21, %v1518_v33 }
 0x676   :  { %v2697_v35 = vpop.f32.mrf.mxu0 }
 0x677   :  { %v1533_v37 = vsel %vm646_vm4, %v1519_v34, -inf }
 0x678   :  { %v1521_v38 = vpop.f32.mrf.mxu0  ;;  %1534 = vmax.xlane.f32.xlu0 %v1533_v37 }
 0x67a   :  { %v2698_v41 = vpop.f32.mrf.mxu0 }
 0x681   :  { %1620 = vrot.lane.b32.xlu1 %v3244_v1, %s3062_s23 }
 0x685   :  { %1668 = vrot.lane.b32.xlu1 %v3290_v6, %s3062_s23 }
 0x689   :  { %1716 = vrot.lane.b32.xlu1 %v3294_v11, %s3062_s23 }
 0x6c5   :  { %v1526_v42 = vpop.xlane.xlu0 %1525 }
 0x6c6   :  { %v1536_v45 = vsub.f32 %v1369_v9, %v1526_v42 }
 0x6c8   :  { %v1540_v49 = vmul.f32 1.442695, %v1536_v45 }
 0x6ca   :  { %2843 = vpow2.f32 %v1540_v49 }
 0x6cd   :  { %v1532_v55 = vpop.xlane.xlu0 %1531 }
 0x6ce   :  { %v1538_v59 = vsub.f32 %v1469_v16, %v1532_v55 }
 0x6d0   :  { %v1544_v61 = vmul.f32 1.442695, %v1538_v59 }
 0x6d2   :  { %2845 = vpow2.f32 %v1544_v61 }
 0x6d7   :  { %v2844_v51 = vpop.eup %2843 }
 0x6d8   :  { %v1548_v54 = vsel %vm646_vm4, %v2844_v51, 0.0 }
 0x6d9   :  { %1549 = vadd.xlane.f32.xlu0 %v1548_v54 }
 0x6df   :  { %v2846_v9 = vpop.eup %2845 }
 0x6e0   :  { %v1554_v14 = vsel %vm646_vm4, %v2846_v9, 0.0 }
 0x6ef   :  { %1572 = vrot.lane.b32.xlu0 %v3242_v63, %s3062_s23 }
 0x6f9   :  { %v1529_v62 = vpop.xlane.xlu1 %1528 }
 0x6fa   :  { %v1537_v2 = vsub.f32 %v1419_v27, %v1529_v62 }
 0x6fc   :  { %v1542_v3 = vmul.f32 1.442695, %v1537_v2 }
 0x6fd   :  { %v1621_v5 = vpop.permute.xlu1 %1620 }
 0x6fe   :  { %2847 = vpow2.f32 %v1542_v3  ;;  %v1626_v8 = vsel %vm698_vm3, %v1621_v5, 0 }
 0x6ff   :  { %2706 = vmatpush3.bf16.msra.mxu0 %v1626_v8 }
 0x700   :  { %2717 = vmatprep.subr.bf16.mxu0 %v3058_v0 }
 0x701   :  { %v1535_v56 = vpop.xlane.xlu0 %1534  ;;  %v1669_v19 = vpop.permute.xlu1 %1668 }
 0x702   :  { %v1539_v60 = vsub.f32 %v1519_v34, %v1535_v56 }
 0x704   :  { %v1546_v16 = vmul.f32 1.442695, %v1539_v60 }
 0x706   :  { %2849 = vpow2.f32 %v1546_v16 }
 0x70b   :  { %v2848_v10 = vpop.eup %2847 }
 0x70c   :  { %v1551_v13 = vsel %vm646_vm4, %v2848_v10, 0.0 }
 0x70d   :  { %1552 = vadd.xlane.f32.xlu1 %v1551_v13 }
 0x70e   :  { %1555 = vadd.xlane.f32.xlu0 %v1554_v14 }
 0x713   :  { %v2850_v17 = vpop.eup %2849 }
 0x714   :  { %v1557_v18 = vsel %vm646_vm4, %v2850_v17, 0.0 }
 0x71e   :  { %1816 = vrot.lane.b32.xlu1 %v3195_v39, %s3063_s26 }
 0x724   :  { %1766 = vrot.lane.b32.xlu0 %v3188_v30, %s3063_s26 }
 0x728   :  { %1764 = vrot.lane.b32.xlu0 %v3202_v44, %s3063_s26 }
 0x72c   :  { %1866 = vrot.lane.b32.xlu0 %v3200_v43, %s3063_s26 }
 0x730   :  { %1864 = vrot.lane.b32.xlu0 %v3223_v52, %s3063_s26 }
 0x742   :  { %1558 = vadd.xlane.f32.xlu1 %v1557_v18 }
 0x753   :  { %1814 = vrot.lane.b32.xlu1 %v3211_v48, %s3063_s26  ;;  %v1674_v48 = vsel %vm698_vm3, %v1669_v19, 0 }
 0x757   :  { %1916 = vrot.lane.b32.xlu1 %v3205_v46, %s3063_s26  ;;  %v1717_v46 = vpop.permute.xlu1 %1716 }
 0x758   :  { %v1722_v32 = vsel %vm698_vm3, %v1717_v46, 0 }
 0x75b   :  { %1914 = vrot.lane.b32.xlu1 %v3227_v53, %s3063_s26 }
 0x762   :  { %v1550_v30 = vpop.xlane.xlu0 %1549 }
 0x763   :  { %2851 = vrcp.f32 %v1550_v30 }
 0x766   :  { %v1573_v39 = vpop.permute.xlu0 %1572 }
 0x767   :  { %v1578_v43 = vsel %vm698_vm3, %v1573_v39, 0 }
 0x768   :  { %2700 = vmatpush3.bf16.msra.mxu1 %v1578_v43 }
 0x769   :  { %2711 = vmatprep.subr.bf16.mxu1 %v3058_v0 }
 0x770   :  { %v2852_v44 = vpop.eup %2851 }
 0x771   :  { %v1564_v52 = vmul.f32 %v2852_v44, %v2844_v51 }
 0x773   :  { %v1568_v20 = vpack.c.bf16 %v1564_v52, %v1564_v52 }
 0x775   :  { %2702 = vmatmul.mubr.msk.bf16.vlgmr.msra.gmra.mxu1 %vm461_vm2, %v1568_v20 }
 0x776   :  { %2712 = vmatpush3.bf16.msra.mxu1 %v1674_v48  ;;  %2713 = vmatprep.mubr.msk.bf16.mxu1 %vm3059_vm0, %v3058_v0 }
 0x777   :  { %2723 = vmatprep.subr.bf16.mxu1 %v3058_v0 }
 0x796   :  { %v1553_v53 = vpop.xlane.xlu1 %1552 }
 0x797   :  { %2853 = vrcp.f32 %v1553_v53  ;;  %v1556_v23 = vpop.xlane.xlu0 %1555 }
 0x798   :  { %2855 = vrcp.f32 %v1556_v23 }
 0x79a   :  { %v1817_v41 = vpop.permute.xlu1 %1816 }
 0x79b   :  { %v1767_v24 = vpop.permute.xlu0 %1766  ;;  %v1822_v55 = vsel %vm461_vm2, %v1817_v41, 0 }
 0x79c   :  { %v1772_v34 = vsel %vm461_vm2, %v1767_v24, 0 }
 0x79f   :  { %v1765_v33 = vpop.permute.xlu0 %1764 }
 0x7a3   :  { %v1867_v35 = vpop.permute.xlu0 %1866 }
 0x7a4   :  { %v2854_v25 = vpop.eup %2853  ;;  %v1872_v37 = vsel %vm461_vm2, %v1867_v35, 0 }
 0x7a5   :  { %v2856_v26 = vpop.eup %2855  ;;  %v1565_v27 = vmul.f32 %v2854_v25, %v2848_v10 }
 0x7a6   :  { %v1566_v28 = vmul.f32 %v2856_v26, %v2846_v9 }
 0x7a7   :  { %v1569_v29 = vpack.c.bf16 %v1565_v27, %v1565_v27  ;;  %v1865_v38 = vpop.permute.xlu0 %1864 }
 0x7a8   :  { %v1570_v31 = vpack.c.bf16 %v1566_v28, %v1566_v28 }
 0x7a9   :  { %2708 = vmatmul.mubr.msk.bf16.vlgmr.msra.gmra.mxu0 %vm461_vm2, %v1569_v29 }
 0x7aa   :  { %2714 = vmatmul.mubr.msk.bf16.vlgmr.msra.gmra.mxu1 %vm461_vm2, %v1570_v31  ;;  %2718 = vmatpush3.bf16.msra.mxu0 %v1722_v32 }
 0x7ab   :  { %2724 = vmatpush3.bf16.xpose.msra.mxu1 %v1772_v34  ;;  %2725 = vmatprep.mubr.msk.bf16.mxu1 %vm3059_vm0, %v3058_v0 }
 0x7ac   :  { %2735 = vmatprep.subr.bf16.mxu1 %v3058_v0  ;;  %2719 = vmatprep.mubr.msk.bf16.mxu0 %vm3059_vm0, %v3058_v0 }
 0x7ad   :  { %2729 = vmatprep.subr.bf16.mxu0 %v3058_v0 }
 0x7b2   :  { %2726 = vmatmul.mubr.msk.bf16.vlgmr.msra.gmra.mxu1 %vm461_vm2, %v1765_v33 }
 0x7b3   :  { %2736 = vmatpush3.bf16.xpose.msra.mxu1 %v1872_v37  ;;  %2737 = vmatprep.mubr.msk.bf16.mxu1 %vm3059_vm0, %v3058_v0 }
 0x7b4   :  { %2747 = vmatprep.subr.bf16.mxu1 %v3058_v0 }
 0x7ba   :  { %2738 = vmatmul.mubr.msk.bf16.vlgmr.msra.gmra.mxu1 %vm461_vm2, %v1865_v38 }
 0x7bb   :  { %2749 = vmatprep.mubr.msk.bf16.mxu1 %vm3059_vm0, %v3058_v0 }
 0x7cb   :  { %v1559_v42 = vpop.xlane.xlu1 %1558 }
 0x7cc   :  { %2857 = vrcp.f32 %v1559_v42 }
 0x7cf   :  { %v1815_v54 = vpop.permute.xlu1 %1814 }
 0x7d3   :  { %v1917_v59 = vpop.permute.xlu1 %1916 }
 0x7d4   :  { %v1922_v61 = vsel %vm461_vm2, %v1917_v59, 0 }
 0x7d7   :  { %v1915_v62 = vpop.permute.xlu1 %1914 }
 0x7d9   :  { %v2858_v45 = vpop.eup %2857 }
 0x7da   :  { %v1567_v49 = vmul.f32 %v2858_v45, %v2850_v17 }
 0x7dc   :  { %v1571_v51 = vpack.c.bf16 %v1567_v49, %v1567_v49 }
 0x7de   :  { %2720 = vmatmul.mubr.msk.bf16.vlgmr.msra.gmra.mxu0 %vm461_vm2, %v1571_v51 }
 0x7df   :  { %2730 = vmatpush3.bf16.xpose.msra.mxu0 %v1822_v55  ;;  %2731 = vmatprep.mubr.msk.bf16.mxu0 %vm3059_vm0, %v3058_v0 }
 0x7e0   :  { %2741 = vmatprep.subr.bf16.mxu0 %v3058_v0 }
 0x7e6   :  { %2732 = vmatmul.mubr.msk.bf16.vlgmr.msra.gmra.mxu0 %vm461_vm2, %v1815_v54 }
 0x7e7   :  { %2742 = vmatpush3.bf16.xpose.msra.mxu0 %v1922_v61  ;;  %2743 = vmatprep.mubr.msk.bf16.mxu0 %vm3059_vm0, %v3058_v0 }
 0x7e8   :  { %2753 = vmatprep.subr.bf16.mxu0 %v3058_v0 }
 0x7ee   :  { %2744 = vmatmul.mubr.msk.bf16.vlgmr.msra.gmra.mxu0 %vm461_vm2, %v1915_v62 }
 0x7ef   :  { %2755 = vmatprep.mubr.msk.bf16.mxu0 %vm3059_vm0, %v3058_v0 }
 0x835   :  { %v3502_v2 = vpop.f32.mrf.mxu1 }
 0x837   :  { %v2703_v3 = vpop.f32.mrf.mxu1 }
 0x839   :  { %v1617_v5 = vpop.f32.mrf.mxu1 }
 0x83b   :  { %v2704_v8 = vpop.f32.mrf.mxu1 }
 0x869   :  { %v3504_v9 = vpop.f32.mrf.mxu0 }
 0x86a   :  { %v1710_v10 = vpop.f32.mrf.mxu1 }
 0x86b   :  { %v2709_v13 = vpop.f32.mrf.mxu0 }
 0x86c   :  { %v2715_v14 = vpop.f32.mrf.mxu1 }
 0x86d   :  { %v1665_v56 = vpop.f32.mrf.mxu0 }
 0x86e   :  { %v1713_v60 = vpop.f32.mrf.mxu1 }
 0x86f   :  { %v2710_v16 = vpop.f32.mrf.mxu0 }
 0x870   :  { %v2716_v17 = vpop.f32.mrf.mxu1 }
 0x872   :  { %v1808_v18 = vpop.f32.mrf.mxu1 }
 0x873   :  { %v1809_v30 = vadd.f32 %v3252_v4, %v1808_v18 }
 0x874   :  { %v2727_v39 = vpop.f32.mrf.mxu1 }
 0x875   :  { %v1964_v43 = vsel %vm646_vm4, %v1809_v30, -inf }
 0x876   :  { %1965 = vmax.xlane.f32.xlu0 %v1964_v43  ;;  %v1811_v44 = vpop.f32.mrf.mxu1 }
 0x878   :  { %v2728_v52 = vpop.f32.mrf.mxu1 }
 0x87a   :  { %v1908_v19 = vpop.f32.mrf.mxu1 }
 0x87b   :  { %v1909_v20 = vadd.f32 %v3259_v15, %v1908_v19 }
 0x87c   :  { %v2739_v48 = vpop.f32.mrf.mxu1 }
 0x87d   :  { %v1970_v46 = vsel %vm646_vm4, %v1909_v20, -inf }
 0x87e   :  { %1971 = vmax.xlane.f32.xlu0 %v1970_v46  ;;  %v1911_v53 = vpop.f32.mrf.mxu1 }
 0x880   :  { %v2740_v23 = vpop.f32.mrf.mxu1 }
 0x89e   :  { %v1758_v24 = vpop.f32.mrf.mxu0 }
 0x8a0   :  { %v2721_v25 = vpop.f32.mrf.mxu0 }
 0x8a2   :  { %v1761_v26 = vpop.f32.mrf.mxu0 }
 0x8a4   :  { %v2722_v27 = vpop.f32.mrf.mxu0 }
 0x8a6   :  { %v1858_v4 = vpop.f32.mrf.mxu0 }
 0x8a7   :  { %v1859_v28 = vadd.f32 %v3255_v7, %v1858_v4 }
 0x8a8   :  { %v2733_v29 = vpop.f32.mrf.mxu0 }
 0x8a9   :  { %v1967_v31 = vsel %vm646_vm4, %v1859_v28, -inf }
 0x8aa   :  { %1968 = vmax.xlane.f32.xlu1 %v1967_v31  ;;  %v1861_v32 = vpop.f32.mrf.mxu0 }
 0x8ac   :  { %v2734_v33 = vpop.f32.mrf.mxu0 }
 0x8ae   :  { %v1958_v15 = vpop.f32.mrf.mxu0 }
 0x8af   :  { %v1959_v34 = vadd.f32 %v3263_v21, %v1958_v15 }
 0x8b0   :  { %v2745_v35 = vpop.f32.mrf.mxu0 }
 0x8b1   :  { %v1973_v37 = vsel %vm646_vm4, %v1959_v34, -inf }
 0x8b2   :  { %v1961_v38 = vpop.f32.mrf.mxu0  ;;  %1974 = vmax.xlane.f32.xlu0 %v1973_v37 }
 0x8b3   :  { %v2810_v38 = vld [vmem:[#allocation13] sm:$0xff]  }
 0x8b4   :  { %v2746_v41 = vpop.f32.mrf.mxu0 }
 0x8ff   :  { %v1966_v42 = vpop.xlane.xlu0 %1965 }
 0x900   :  { %v1976_v45 = vsub.f32 %v1809_v30, %v1966_v42 }
 0x902   :  { %v1980_v49 = vmul.f32 1.442695, %v1976_v45 }
 0x904   :  { %2859 = vpow2.f32 %v1980_v49 }
 0x907   :  { %v1972_v7 = vpop.xlane.xlu0 %1971 }
 0x908   :  { %v1978_v51 = vsub.f32 %v1909_v20, %v1972_v7 }
 0x90a   :  { %v1984_v54 = vmul.f32 1.442695, %v1978_v51 }
 0x90c   :  { %2861 = vpow2.f32 %v1984_v54 }
 0x911   :  { %v2860_v55 = vpop.eup %2859 }
 0x912   :  { %v1988_v59 = vsel %vm646_vm4, %v2860_v55, 0.0 }
 0x913   :  { %1989 = vadd.xlane.f32.xlu0 %v1988_v59 }
 0x919   :  { %v2862_v61 = vpop.eup %2861 }
 0x91a   :  { %v1994_v21 = vsel %vm646_vm4, %v2862_v61, 0.0 }
 0x91b   :  { %1995 = vadd.xlane.f32.xlu0 %v1994_v21 }
 0x931   :  { %2012 = vrot.lane.b32.xlu0 %v3242_v63, %s3063_s26 }
 0x933   :  { %v1969_v62 = vpop.xlane.xlu1 %1968 }
 0x934   :  { %v1977_v3 = vsub.f32 %v1859_v28, %v1969_v62  ;;  %v2809_v28 = vld [vmem:[#allocation13 + $0x8] sm:$0xff]  }
 0x935   :  { %2208 = vrot.lane.b32.xlu0 %v3418_v50, %s3064_s27 }
 0x936   :  { %v1982_v5 = vmul.f32 1.442695, %v1977_v3 }
 0x938   :  { %2863 = vpow2.f32 %v1982_v5 }
 0x939   :  { %2212 = vrot.lane.b32.xlu0 %v3422_v58, %s3064_s27 }
 0x93b   :  { %v1975_v63 = vpop.xlane.xlu0 %1974 }
 0x93c   :  { %v1979_v50 = vsub.f32 %v1959_v34, %v1975_v63 }
 0x93d   :  { %2224 = vrot.lane.b32.xlu0 %v3502_v2, %s3054_s29 }
 0x93e   :  { %v1986_v14 = vmul.f32 1.442695, %v1979_v50 }
 0x940   :  { %2865 = vpow2.f32 %v1986_v14 }
 0x941   :  { %2228 = vrot.lane.b32.xlu0 %v1710_v10, %s3054_s29 }
 0x945   :  { %v2864_v8 = vpop.eup %2863 }
 0x946   :  { %v1991_v13 = vsel %vm646_vm4, %v2864_v8, 0.0 }
 0x947   :  { %1992 = vadd.xlane.f32.xlu1 %v1991_v13 }
 0x94d   :  { %v2866_v58 = vpop.eup %2865 }
 0x94e   :  { %v1997_v56 = vsel %vm646_vm4, %v2866_v58, 0.0 }
 0x958   :  { %2060 = vrot.lane.b32.xlu1 %v3244_v1, %s3063_s26 }
 0x95c   :  { %2108 = vrot.lane.b32.xlu1 %v3290_v6, %s3063_s26 }
 0x980   :  { %1998 = vadd.xlane.f32.xlu1 %v1997_v56 }
 0x991   :  { %2156 = vrot.lane.b32.xlu1 %v3294_v11, %s3063_s26 }
 0x995   :  { %2210 = vrot.lane.b32.xlu1 %v3420_v57, %s3064_s27 }
 0x999   :  { %2214 = vrot.lane.b32.xlu1 %v3428_v22, %s3064_s27 }
 0x99c   :  { %v1990_v2 = vpop.xlane.xlu0 %1989 }
 0x99d   :  { %2867 = vrcp.f32 %v1990_v2  ;;  %2226 = vrot.lane.b32.xlu1 %v3504_v9, %s3054_s29 }
 0x9a1   :  { %2230 = vrot.lane.b32.xlu1 %v1758_v24, %s3054_s29 }
 0x9a4   :  { %v1996_v1 = vpop.xlane.xlu0 %1995 }
 0x9a5   :  { %2869 = vrcp.f32 %v1996_v1 }
 0x9a8   :  { %v2013_v6 = vpop.permute.xlu0 %2012 }
 0x9a9   :  { %v2018_v10 = vsel %vm698_vm3, %v2013_v6, 0 }
 0x9aa   :  { %v2868_v60 = vpop.eup %2867  ;;  %2748 = vmatpush3.bf16.msra.mxu1 %v2018_v10 }
 0x9ab   :  { %v2004_v16 = vmul.f32 %v2868_v60, %v2860_v55  ;;  %2759 = vmatprep.subr.bf16.mxu1 %v3058_v0 }
 0x9ac   :  { %v2209_v7 = vpop.permute.xlu0 %2208 }
 0x9ad   :  { %v2008_v11 = vpack.c.bf16 %v2004_v16, %v2004_v16  ;;  %v2252_v63 = vsel %vm461_vm2, %v3334_v36, %v2209_v7  ;;  %v2461_v36 = vld [vmem:[%s3599_s11] ss:$0 sm:$0xff] }
 0x9af   :  { %2750 = vmatmul.mubr.msk.bf16.vlgmr.msra.gmra.mxu1 %vm461_vm2, %v2008_v11 }
 0x9b0   :  { %2761 = vmatprep.mubr.msk.bf16.mxu1 %vm3059_vm0, %v3058_v0 }
 0x9b2   :  { %v2870_v22 = vpop.eup %2869 }
 0x9b3   :  { %v2006_v18 = vmul.f32 %v2870_v22, %v2862_v61 }
 0x9b5   :  { %v2010_v43 = vpack.c.bf16 %v2006_v18, %v2006_v18 }
 0x9d0   :  { %v1993_v57 = vpop.xlane.xlu1 %1992 }
 0x9d1   :  { %2871 = vrcp.f32 %v1993_v57 }
 0x9d4   :  { %v2061_v9 = vpop.permute.xlu1 %2060 }
 0x9d5   :  { %v2066_v17 = vsel %vm698_vm3, %v2061_v9, 0  ;;  %v2466_v9 = vld [vmem:[%s3591_s3 + $0x1] ss:$0 sm:$0xff] }
 0x9d6   :  { %2754 = vmatpush3.bf16.msra.mxu0 %v2066_v17 }
 0x9d7   :  { %2765 = vmatprep.subr.bf16.mxu0 %v3058_v0 }
 0x9d8   :  { %v2109_v30 = vpop.permute.xlu1 %2108 }
 0x9d9   :  { %v2114_v39 = vsel %vm698_vm3, %v2109_v30, 0 }
 0x9da   :  { %2760 = vmatpush3.bf16.msra.mxu1 %v2114_v39  ;;  %v2467_v39 = vld [vmem:[%s3591_s3 + $0x2] ss:$0 sm:$0xff] }
 0x9db   :  { %2771 = vmatprep.subr.bf16.mxu1 %v3058_v0 }
 0x9dd   :  { %2762 = vmatmul.mubr.msk.bf16.vlgmr.msra.gmra.mxu1 %vm461_vm2, %v2010_v43 }
 0x9de   :  { %v2872_v44 = vpop.eup %2871  ;;  %2775 = vmatprep.mubr.msk.bf16.mxu1 %vm3059_vm0, %v3058_v0  ;;  %2772 = vmatpush3.bf16.msra.mxu1 %v2809_v28 }
 0x9df   :  { %v2005_v52 = vmul.f32 %v2872_v44, %v2864_v8  ;;  %2773 = vmatprep.subr.bf16.mxu1 %v3058_v0 }
 0x9e1   :  { %v2009_v19 = vpack.c.bf16 %v2005_v52, %v2005_v52 }
 0x9e2   :  { %2774 = vmatpush3.bf16.msra.mxu1 %v2810_v38 }
 0x9e3   :  { %2756 = vmatmul.mubr.msk.bf16.vlgmr.msra.gmra.mxu0 %vm461_vm2, %v2009_v19  ;;  %v2468_v19 = vld [vmem:[%s3591_s3 + $0x3] ss:$0 sm:$0xff] }
 0x9e4   :  { %2767 = vmatprep.mubr.msk.bf16.mxu0 %vm3059_vm0, %v3058_v0  ;;  %v2213_v0 = vpop.permute.xlu0 %2212 }
 0x9e5   :  { %v2254_v50 = vsel %vm461_vm2, %v3338_v47, %v2213_v0  ;;  %v2465_v47 = vld [vmem:[%s3591_s3] ss:$0 sm:$0xff] }
 0x9e8   :  { %v2225_v55 = vpop.permute.xlu0 %2224 }
 0x9e9   :  { %v2257_v56 = vsel %vm2256_vm5, %v2252_v63, %v2225_v55 }
 0x9ec   :  { %v2229_v61 = vpop.permute.xlu0 %2228 }
 0x9ed   :  { %v2259_v2 = vsel %vm2256_vm5, %v2254_v50, %v2229_v61 }
 0xa09   :  { %v1999_v20 = vpop.xlane.xlu1 %1998 }
 0xa0a   :  { %2873 = vrcp.f32 %v1999_v20 }
 0xa0d   :  { %v2157_v48 = vpop.permute.xlu1 %2156 }
 0xa0e   :  { %v2162_v46 = vsel %vm698_vm3, %v2157_v48, 0 }
 0xa0f   :  { %2766 = vmatpush3.bf16.msra.mxu0 %v2162_v46 }
 0xa11   :  { %v2211_v51 = vpop.permute.xlu1 %2210 }
 0xa12   :  { %v2253_v5 = vsel %vm461_vm2, %v3336_v40, %v2211_v51 }
 0xa15   :  { %v2215_v54 = vpop.permute.xlu1 %2214 }
 0xa16   :  { %v2255_v14 = vsel %vm461_vm2, %v3344_v12, %v2215_v54 }
 0xa17   :  { %v2874_v53 = vpop.eup %2873 }
 0xa18   :  { %v2007_v23 = vmul.f32 %v2874_v53, %v2866_v58 }
 0xa19   :  { %v2227_v59 = vpop.permute.xlu1 %2226 }
 0xa1a   :  { %v2011_v24 = vpack.c.bf16 %v2007_v23, %v2007_v23  ;;  %v2258_v8 = vsel %vm2256_vm5, %v2253_v5, %v2227_v59 }
 0xa1c   :  { %2768 = vmatmul.mubr.msk.bf16.vlgmr.msra.gmra.mxu0 %vm461_vm2, %v2011_v24 }
 0xa1d   :  { %v2231_v21 = vpop.permute.xlu1 %2230 }
 0xa1e   :  { %v2260_v1 = vsel %vm2256_vm5, %v2255_v14, %v2231_v21 }
 0xa6f   :  { %v2054_v25 = vpop.f32.mrf.mxu1 }
 0xa70   :  { %2240 = vrot.lane.b32.xlu0 %v2054_v25, %s3065_s28 }
 0xa71   :  { %v2751_v26 = vpop.f32.mrf.mxu1 }
 0xa73   :  { %v2057_v27 = vpop.f32.mrf.mxu1 }
 0xa75   :  { %v2752_v4 = vpop.f32.mrf.mxu1 }
 0xa9d   :  { %v2150_v29 = vpop.f32.mrf.mxu1 }
 0xa9e   :  { %2244 = vrot.lane.b32.xlu0 %v2150_v29, %s3065_s28 }
 0xa9f   :  { %v2763_v31 = vpop.f32.mrf.mxu1 }
 0xaa1   :  { %v2153_v32 = vpop.f32.mrf.mxu1 }
 0xaa3   :  { %v2102_v33 = vpop.f32.mrf.mxu0  ;;  %v2764_v15 = vpop.f32.mrf.mxu1 }
 0xaa4   :  { %2242 = vrot.lane.b32.xlu1 %v2102_v33, %s3065_s28 }
 0xaa5   :  { %v2757_v34 = vpop.f32.mrf.mxu0 }
 0xaa7   :  { %v2105_v35 = vpop.f32.mrf.mxu0 }
 0xaa9   :  { %v2758_v37 = vpop.f32.mrf.mxu0 }
 0xadc   :  { %v2198_v41 = vpop.f32.mrf.mxu0 }
 0xadd   :  { %2246 = vrot.lane.b32.xlu1 %v2198_v41, %s3065_s28 }
 0xade   :  { %v2769_v42 = vpop.f32.mrf.mxu0 }
 0xae0   :  { %v2201_v45 = vpop.f32.mrf.mxu0 }
 0xae2   :  { %v2770_v49 = vpop.f32.mrf.mxu0  ;;  %v2241_v62 = vpop.permute.xlu0 %2240 }
 0xae3   :  { %v2262_v10 = vsel %vm2261_vm6, %v2257_v56, %v2241_v62 }
 0xb10   :  { %v2245_v13 = vpop.permute.xlu0 %2244 }
 0xb11   :  { %v2264_v60 = vsel %vm2261_vm6, %v2259_v2, %v2245_v13 }
 0xb16   :  { %v2243_v3 = vpop.permute.xlu1 %2242 }
 0xb17   :  { %v2263_v58 = vsel %vm2261_vm6, %v2258_v8, %v2243_v3 }
 0xb18   :  { %v2270_v16 = vcombine.low %v2262_v10, %v2263_v58 }
 0xb4f   :  { %v2247_v6 = vpop.permute.xlu1 %2246 }
 0xb50   :  { %v2265_v40 = vsel %vm2261_vm6, %v2260_v1, %v2247_v6 }
 0xb51   :  { %v2271_v11 = vcombine.low %v2264_v60, %v2265_v40 }
 0xb53   :  { %v2274_v57 = vpack.c.bf16 %v2271_v11, %v2270_v16 }
 0xb55   :  { %2776 = vmatmul.mubr.msk.bf16.vlgmr.msra.gmra.mxu1 %vm190_vm1, %v2274_v57 }
 0xc15   :  { %v2335_v12 = vpop.f32.mrf.mxu1 }
 0xc16   :  { %v2336_v22 = vadd.f32 %v2461_v36, %v2335_v12 }
 0xc17   :  { %v2777_v17 = vpop.f32.mrf.mxu1 }
 0xc18   :  { %v2344_v18 = vcombine.high %v2336_v22, %v2336_v22  ;;  %v2372_v30 = vmul.f32 %v2465_v47, %v2336_v22 }
 0xc19   :  { %v2338_v43 = vpop.f32.mrf.mxu1 }
 0xc1a   :  { %v2373_v44 = vmul.f32 %v2466_v9, %v2344_v18  ;;  %2377 = vst.msk [vmem:[#allocation14] sm:$0xf] %vm2376_vm7, %v2372_v30  ;;  %v2339_v52 = vadd.f32 %v2461_v36, %v2338_v43 }
 0xc1b   :  { %v2778_v20 = vpop.f32.mrf.mxu1 }
 0xc1c   :  { %2378 = vst.msk [vmem:[#allocation14 + $0x4] sm:$0xf] %vm2376_vm7, %v2373_v44  ;;  %v2345_v48 = vcombine.high %v2339_v52, %v2339_v52  ;;  %v2374_v46 = vmul.f32 %v2467_v39, %v2339_v52 }
 0xc1e   :  { %v2375_v53 = vmul.f32 %v2468_v19, %v2345_v48  ;;  %2379 = vst.msk [vmem:[#allocation14 + $0x8] sm:$0xf] %vm2376_vm7, %v2374_v46 }
 0xc20   :  { %2380 = vst.msk [vmem:[#allocation14 + $0xc] sm:$0xf] %vm2376_vm7, %v2375_v53 }
 0xc21   :  { %3026 = shalt.err (!%p3023_p11)
}
 0xc22   :  { %2392 = dma.vmem_to_hbm [thread:$0]  %s2387_s18, 256, %s3600_s12, [#allocation4], %s3046_s24, %s3046_s24, %s3047_s25  }
 0xc23   :  { %3043 = dma.done.wait [#allocation4], 256  }
 0xc24   :  { %3044 = vsyncadd [#allocation4], 4294967040 }
 0xc25   :  { %2396 = vsyncpa [#allocation3], 1 }
 0xc26   :  { %2397 = vsyncpa [#allocation6], 1 }
 0xc27   :  { %2398 = vsyncpa [#allocation9], 1 }
 0xc28   :  { %2399 = vsyncpa [#allocation12], 1 }
 0xc29   :  { %2400 = vsyncpa [#allocation4], 1 }

</bundles_post_ra>
